<compile_context>
chip_gen: v5e
topology: v5e:2x2
jax: 0.10.0
libtpu: 0.0.40
codegen_flags: <defaults>
</compile_context>

<pallas_src>
import jax
import jax.numpy as jnp
from jax import lax
from jax.experimental import pallas as pl
from jax.experimental.pallas import tpu as pltpu


# ------------------------------ fused kernel --------------------------------

_WEIGHT_KEYS = (
    "w_qkv_s", "b_qkv_s", "w_o_s", "b_o_s",
    "w_q_c", "b_q_c", "w_kv_c", "b_kv_c", "w_o_c", "b_o_c",
    "w1", "b1", "w2", "b2",
    "ln1_g", "ln1_b", "ln2_g", "ln2_b", "ln3_g", "ln3_b",
    "norm_g", "norm_b",
)


def make_decoder_kernel(*, St, Sm, D, H, L, eps, tie_weights, need_weights,
                        has_self_bias, has_cross_bias):
    Dh = D // H

    def layer_norm(x, g, b):
        mu = jnp.mean(x, axis=-1, keepdims=True)
        var = jnp.mean(jnp.square(x - mu), axis=-1, keepdims=True)
        return (x - mu) * lax.rsqrt(var + eps) * g + b

    def split_heads_bf16(x2d):
        # (S, D) f32 -> (H, S, Dh) bf16 via static lane slices + leading stack.
        return jnp.stack(
            [x2d[:, h * Dh:(h + 1) * Dh] for h in range(H)], axis=0
        ).astype(jnp.bfloat16)

    def merge_heads(xh):
        # (H, S, Dh) -> (S, D): lane-axis concat of per-head contexts.
        return jnp.concatenate([xh[h] for h in range(H)], axis=-1)

    def kernel(*refs):
        it = iter(refs)
        tgt_ref = next(it)                       # (1, St, D)
        mem_ref = next(it)                       # (1, Sm, D)
        sb_ref = next(it) if has_self_bias else None   # (1, St, St)
        cb_ref = next(it) if has_cross_bias else None  # (1, St, Sm)
        (w_qkv_s, b_qkv_s, w_o_s, b_o_s,
         w_q_c, b_q_c, w_kv_c, b_kv_c, w_o_c, b_o_c,
         w1, b1, w2, b2,
         ln1_g, ln1_b, ln2_g, ln2_b, ln3_g, ln3_b,
         nrm_g, nrm_b) = (next(it) for _ in range(22))
        out_ref = next(it)                       # (1, St, D)
        saw_ref = next(it) if need_weights else None   # (1, 1, H*St, St)
        caw_ref = next(it) if need_weights else None   # (1, 1, H*St, Sm)
        state = next(it)                         # VMEM (St, D) f32, persists over l
        kv_c = next(it)                          # VMEM (Sm, 2D) f32, cross K/V

        l = pl.program_id(1)

        @pl.when(l == 0)
        def _init():
            state[...] = tgt_ref[0].astype(jnp.float32)

        def project_cross_kv():
            mem_bf = mem_ref[0].astype(jnp.bfloat16)          # (Sm, D)
            kv_c[...] = (jnp.dot(mem_bf, w_kv_c[0],
                                 preferred_element_type=jnp.float32)
                         + b_kv_c[0])

        if tie_weights:
            # Layer-invariant with tied weights: compute once per batch block.
            @pl.when(l == 0)
            def _kv():
                project_cross_kv()
        else:
            project_cross_kv()

        def attention(q2, k2, v2, bias_ref, w_ref):
            # q2 (St, D) pre-scaled f32; k2/v2 (Sk, D) f32.
            q_h = split_heads_bf16(q2)                          # (H, St, Dh)
            k_h = split_heads_bf16(k2)                          # (H, Sk, Dh)
            v_h = split_heads_bf16(v2)                          # (H, Sk, Dh)
            s = jnp.einsum('hqd,hkd->hqk', q_h, k_h,
                           preferred_element_type=jnp.float32)  # (H, St, Sk)
            if bias_ref is not None:
                s = s + bias_ref[0][None, :, :]
            m = jnp.max(s, axis=-1, keepdims=True)
            p = jnp.exp(s - m)
            denom = jnp.sum(p, axis=-1, keepdims=True)
            if w_ref is not None:
                # Exact normalization on the returned-weights path.
                p = p * (1.0 / denom)
                slab = jnp.concatenate([p[h] for h in range(H)], axis=0)
                w_ref[0, 0, :, :] = slab                        # (H*St, Sk) slab
            else:
                p = p * pl.reciprocal(denom, approx=True)       # EUP slot
            ctx_h = jnp.einsum('hqk,hkd->hqd', p.astype(jnp.bfloat16), v_h,
                               preferred_element_type=jnp.float32)
            return merge_heads(ctx_h)                           # (St, D) f32

        x = state[...]                                          # (St, D) f32

        # ---------------- self attention + add & norm ----------------
        qkv = (jnp.dot(x.astype(jnp.bfloat16), w_qkv_s[0],
                       preferred_element_type=jnp.float32) + b_qkv_s[0])
        ctx = attention(qkv[:, 0:D], qkv[:, D:2 * D], qkv[:, 2 * D:3 * D],
                        sb_ref, saw_ref)
        attn = (jnp.dot(ctx.astype(jnp.bfloat16), w_o_s[0],
                        preferred_element_type=jnp.float32) + b_o_s[0])
        x = layer_norm(x + attn, ln1_g[0], ln1_b[0])

        # ---------------- cross attention + add & norm ----------------
        q_c = (jnp.dot(x.astype(jnp.bfloat16), w_q_c[0],
                       preferred_element_type=jnp.float32) + b_q_c[0])
        kv = kv_c[...]
        ctx = attention(q_c, kv[:, 0:D], kv[:, D:2 * D], cb_ref, caw_ref)
        attn = (jnp.dot(ctx.astype(jnp.bfloat16), w_o_c[0],
                        preferred_element_type=jnp.float32) + b_o_c[0])
        x = layer_norm(x + attn, ln2_g[0], ln2_b[0])

        # ---------------- feed-forward (relu) + add & norm ----------------
        hdn = jnp.maximum(
            jnp.dot(x.astype(jnp.bfloat16), w1[0],
                    preferred_element_type=jnp.float32) + b1[0], 0.0)
        ffn = (jnp.dot(hdn.astype(jnp.bfloat16), w2[0],
                       preferred_element_type=jnp.float32) + b2[0])
        x = layer_norm(x + ffn, ln3_g[0], ln3_b[0])

        state[...] = x

        @pl.when(l == L - 1)
        def _finalize():
            out_ref[0, :, :] = layer_norm(x, nrm_g[0], nrm_b[0]).astype(out_ref.dtype)

    return kernel


# ------------------------------ wrapper (host) -------------------------------

def _make_bias(attn_mask, key_padding_mask, B, Sq, Sk):
    """Additive per-batch attention bias (B, Sq, Sk) or None."""
    if attn_mask is None and key_padding_mask is None:
        return None
    bias = jnp.zeros((B, Sq, Sk), jnp.float32)
    if attn_mask is not None:
        am = attn_mask
        if am.dtype == jnp.bool_:
            am = jnp.where(am, -1e9, 0.0)
        bias = bias + am[None, :, :].astype(jnp.float32)
    if key_padding_mask is not None:  # bool (B, Sk), True = pad
        pad = jnp.where(key_padding_mask, -1e9, 0.0).astype(jnp.float32)
        bias = bias + pad[:, None, :]
    return bias


def transformer_decoder_forward(tgt, memory, packed, *, num_hidden_layers,
                                num_heads, eps, tie_weights=True,
                                tgt_mask=None, memory_mask=None,
                                tgt_key_padding_mask=None,
                                memory_key_padding_mask=None,
                                need_attention_weights=False):
    B, St, D = tgt.shape
    Sm = memory.shape[1]
    H = num_heads
    L = num_hidden_layers

    self_bias = _make_bias(tgt_mask, tgt_key_padding_mask, B, St, St)
    cross_bias = _make_bias(memory_mask, memory_key_padding_mask, B, St, Sm)

    kernel = make_decoder_kernel(
        St=St, Sm=Sm, D=D, H=H, L=L, eps=eps, tie_weights=tie_weights,
        need_weights=need_attention_weights,
        has_self_bias=self_bias is not None,
        has_cross_bias=cross_bias is not None)

    idx_batch = lambda b, l: (b, 0, 0)
    idx_tied = lambda b, l: (0, 0, 0)
    idx_layer = lambda b, l: (l, 0, 0)

    inputs = [tgt, memory]
    in_specs = [pl.BlockSpec((1, St, D), idx_batch),
                pl.BlockSpec((1, Sm, D), idx_batch)]
    if self_bias is not None:
        inputs.append(self_bias)
        in_specs.append(pl.BlockSpec((1, St, St), idx_batch))
    if cross_bias is not None:
        inputs.append(cross_bias)
        in_specs.append(pl.BlockSpec((1, St, Sm), idx_batch))
    for k in _WEIGHT_KEYS:
        w = packed[k]
        inputs.append(w)
        idx = idx_tied if (tie_weights or k in ("norm_g", "norm_b")) else idx_layer
        # TODO(synk): at realistic weight sizes, add pipeline_mode=pl.Buffered(1)
        # on the constant-index (resident) weights to avoid double-buffered VMEM
        # on v7x's 64 MiB.
        in_specs.append(pl.BlockSpec((1,) + w.shape[1:], idx))

    out_shapes = [jax.ShapeDtypeStruct((B, St, D), tgt.dtype)]
    out_specs = [pl.BlockSpec((1, St, D), idx_batch)]
    if need_attention_weights:
        # One lane-contiguous (H*St, Sk) slab per (layer, batch) grid step.
        out_shapes += [jax.ShapeDtypeStruct((L, B, H * St, St), jnp.float32),
                       jax.ShapeDtypeStruct((L, B, H * St, Sm), jnp.float32)]
        out_specs += [pl.BlockSpec((1, 1, H * St, St), lambda b, l: (l, b, 0, 0)),
                      pl.BlockSpec((1, 1, H * St, Sm), lambda b, l: (l, b, 0, 0))]

    results = pl.pallas_call(
        kernel,
        grid=(B, L),
        in_specs=in_specs,
        out_specs=out_specs,
        out_shape=out_shapes,
        scratch_shapes=[pltpu.VMEM((St, D), jnp.float32),       # running tgt state
                        pltpu.VMEM((Sm, 2 * D), jnp.float32)],  # cross-attn K/V
        compiler_params=pltpu.CompilerParams(
            dimension_semantics=("parallel", "arbitrary"),
            vmem_limit_bytes=48 * 1024 * 1024),
    )(*inputs)

    if need_attention_weights:
        out, saw, caw = results
        saw = saw.reshape(L, B, H, St, St)
        caw = caw.reshape(L, B, H, St, Sm)
        sa_ws = tuple(saw[l] for l in range(L))
        ca_ws = tuple(caw[l] for l in range(L))
    else:
        out = results[0]
        sa_ws = tuple(None for _ in range(L))
        ca_ws = tuple(None for _ in range(L))
    return out, sa_ws, ca_ws


# ----------------------------- parameter setup -------------------------------

def init_attn_params(key, d_model):
    ks = jax.random.split(key, 4)
    s = 0.02
    return {
        "wq": s * jax.random.normal(ks[0], (d_model, d_model), jnp.float32),
        "bq": jnp.zeros((d_model,), jnp.float32),
        "wk": s * jax.random.normal(ks[1], (d_model, d_model), jnp.float32),
        "bk": jnp.zeros((d_model,), jnp.float32),
        "wv": s * jax.random.normal(ks[2], (d_model, d_model), jnp.float32),
        "bv": jnp.zeros((d_model,), jnp.float32),
        "wo": s * jax.random.normal(ks[3], (d_model, d_model), jnp.float32),
        "bo": jnp.zeros((d_model,), jnp.float32),
    }


def init_layer_params(key, d_model, d_ff):
    ks = jax.random.split(key, 4)
    s = 0.02
    return {
        "self_attn": init_attn_params(ks[0], d_model),
        "cross_attn": init_attn_params(ks[1], d_model),
        "w1": s * jax.random.normal(ks[2], (d_model, d_ff), jnp.float32),
        "b1": jnp.zeros((d_ff,), jnp.float32),
        "w2": s * jax.random.normal(ks[3], (d_ff, d_model), jnp.float32),
        "b2": jnp.zeros((d_model,), jnp.float32),
        "ln1_g": jnp.ones((d_model,), jnp.float32),
        "ln1_b": jnp.zeros((d_model,), jnp.float32),
        "ln2_g": jnp.ones((d_model,), jnp.float32),
        "ln2_b": jnp.zeros((d_model,), jnp.float32),
        "ln3_g": jnp.ones((d_model,), jnp.float32),
        "ln3_b": jnp.zeros((d_model,), jnp.float32),
    }


def pack_decoder_params(params, d_model, num_heads, tie_weights):
    """Fuse QKV / KV weights (bf16 MXU operands), fold 1/sqrt(Dh) into q, stack layers."""
    layer_list = [params["layer"]] if tie_weights else list(params["layers"])
    Dh = d_model // num_heads
    scale = 1.0 / (Dh ** 0.5)
    bf = lambda w: w.astype(jnp.bfloat16)

    def pack_layer(p):
        sa, ca = p["self_attn"], p["cross_attn"]
        w_qkv = jnp.concatenate([sa["wq"] * scale, sa["wk"], sa["wv"]], axis=1)
        b_qkv = jnp.concatenate([sa["bq"] * scale, sa["bk"], sa["bv"]], axis=0)[None, :]
        w_kv_c = jnp.concatenate([ca["wk"], ca["wv"]], axis=1)
        b_kv_c = jnp.concatenate([ca["bk"], ca["bv"]], axis=0)[None, :]
        return {
            "w_qkv_s": bf(w_qkv), "b_qkv_s": b_qkv,
            "w_o_s": bf(sa["wo"]), "b_o_s": sa["bo"][None, :],
            "w_q_c": bf(ca["wq"] * scale), "b_q_c": (ca["bq"] * scale)[None, :],
            "w_kv_c": bf(w_kv_c), "b_kv_c": b_kv_c,
            "w_o_c": bf(ca["wo"]), "b_o_c": ca["bo"][None, :],
            "w1": bf(p["w1"]), "b1": p["b1"][None, :],
            "w2": bf(p["w2"]), "b2": p["b2"][None, :],
            "ln1_g": p["ln1_g"][None, :], "ln1_b": p["ln1_b"][None, :],
            "ln2_g": p["ln2_g"][None, :], "ln2_b": p["ln2_b"][None, :],
            "ln3_g": p["ln3_g"][None, :], "ln3_b": p["ln3_b"][None, :],
        }

    packed_layers = [pack_layer(p) for p in layer_list]
    packed = {k: jnp.stack([pl_[k] for pl_ in packed_layers], axis=0)
              for k in packed_layers[0]}
    packed["norm_g"] = params["norm_g"][None, None, :]
    packed["norm_b"] = params["norm_b"][None, None, :]
    return packed


# ----------------------------------- main ------------------------------------

if __name__ == "__main__":
    # config: decoder_hidden_size=32, heads=4, ffn=64, decoder_num_hidden_layers=2,
    # layer_norm_eps=1e-5, tie_weights=True
    B, S_tgt, S_mem, D, H, FF, L = 2, 8, 8, 32, 4, 64, 2
    EPS = 1e-5

    root = jax.random.PRNGKey(0)
    k_tgt, k_mem, k_par = jax.random.split(root, 3)
    tgt = jax.random.normal(k_tgt, (B, S_tgt, D), jnp.float32)
    memory = jax.random.normal(k_mem, (B, S_mem, D), jnp.float32)

    params = {
        "layer": init_layer_params(k_par, D, FF),   # tie_weights=True: one shared layer
        "norm_g": jnp.ones((D,), jnp.float32),
        "norm_b": jnp.zeros((D,), jnp.float32),
    }
    packed = pack_decoder_params(params, D, H, tie_weights=True)

    out, sa_ws, ca_ws = transformer_decoder_forward(
        tgt, memory, packed,
        num_hidden_layers=L, num_heads=H, eps=EPS, tie_weights=True,
        need_attention_weights=True)

    jax.block_until_ready(out)
    for w in sa_ws + ca_ws:
        if w is not None:
            jax.block_until_ready(w)

    assert out.shape == (B, S_tgt, D)
    assert len(sa_ws) == L and len(ca_ws) == L
    assert sa_ws[0].shape == (B, H, S_tgt, S_tgt)
    assert ca_ws[0].shape == (B, H, S_tgt, S_mem)
    assert bool(jnp.all(jnp.isfinite(out)))
    # attention weights should be (near-)normalized rows
    assert bool(jnp.all(jnp.abs(jnp.sum(sa_ws[0], axis=-1) - 1.0) < 1e-3))
    print("KERNEL_OK")
</pallas_src>

<mosaic_0001>
module attributes {stable_mosaic.version = 11 : i64} {
  func.func @kernel(%arg0: i32, %arg1: i32, %arg2: memref<1x8x32xf32, #tpu.memory_space<vmem>>, %arg3: memref<1x8x32xf32, #tpu.memory_space<vmem>>, %arg4: memref<1x32x96xbf16, #tpu.memory_space<vmem>>, %arg5: memref<1x1x96xf32, #tpu.memory_space<vmem>>, %arg6: memref<1x32x32xbf16, #tpu.memory_space<vmem>>, %arg7: memref<1x1x32xf32, #tpu.memory_space<vmem>>, %arg8: memref<1x32x32xbf16, #tpu.memory_space<vmem>>, %arg9: memref<1x1x32xf32, #tpu.memory_space<vmem>>, %arg10: memref<1x32x64xbf16, #tpu.memory_space<vmem>>, %arg11: memref<1x1x64xf32, #tpu.memory_space<vmem>>, %arg12: memref<1x32x32xbf16, #tpu.memory_space<vmem>>, %arg13: memref<1x1x32xf32, #tpu.memory_space<vmem>>, %arg14: memref<1x32x64xbf16, #tpu.memory_space<vmem>>, %arg15: memref<1x1x64xf32, #tpu.memory_space<vmem>>, %arg16: memref<1x64x32xbf16, #tpu.memory_space<vmem>>, %arg17: memref<1x1x32xf32, #tpu.memory_space<vmem>>, %arg18: memref<1x1x32xf32, #tpu.memory_space<vmem>>, %arg19: memref<1x1x32xf32, #tpu.memory_space<vmem>>, %arg20: memref<1x1x32xf32, #tpu.memory_space<vmem>>, %arg21: memref<1x1x32xf32, #tpu.memory_space<vmem>>, %arg22: memref<1x1x32xf32, #tpu.memory_space<vmem>>, %arg23: memref<1x1x32xf32, #tpu.memory_space<vmem>>, %arg24: memref<1x1x32xf32, #tpu.memory_space<vmem>>, %arg25: memref<1x1x32xf32, #tpu.memory_space<vmem>>, %arg26: memref<1x8x32xf32, #tpu.memory_space<vmem>>, %arg27: memref<1x1x32x8xf32, #tpu.memory_space<vmem>>, %arg28: memref<1x1x32x8xf32, #tpu.memory_space<vmem>>, %arg29: memref<8x32xf32, #tpu.memory_space<vmem>>, %arg30: memref<8x64xf32, #tpu.memory_space<vmem>>) attributes {dimension_semantics = [#tpu.dimension_semantics<parallel>, #tpu.dimension_semantics<arbitrary>], iteration_bounds = array<i64: 2, 2>, scalar_prefetch = 0 : i64, scratch_operands = 2 : i64, tpu.core_type = #tpu.core_type<tc>, window_params = [{transform_indices = @transform_0, window_bounds = array<i64: 1, 8, 32>}, {transform_indices = @transform_1, window_bounds = array<i64: 1, 8, 32>}, {pipeline_mode = #tpu.pipeline_mode<synchronous>, transform_indices = @transform_2, window_bounds = array<i64: 1, 32, 96>}, {pipeline_mode = #tpu.pipeline_mode<synchronous>, transform_indices = @transform_3, window_bounds = array<i64: 1, 1, 96>}, {pipeline_mode = #tpu.pipeline_mode<synchronous>, transform_indices = @transform_4, window_bounds = array<i64: 1, 32, 32>}, {pipeline_mode = #tpu.pipeline_mode<synchronous>, transform_indices = @transform_5, window_bounds = array<i64: 1, 1, 32>}, {pipeline_mode = #tpu.pipeline_mode<synchronous>, transform_indices = @transform_6, window_bounds = array<i64: 1, 32, 32>}, {pipeline_mode = #tpu.pipeline_mode<synchronous>, transform_indices = @transform_7, window_bounds = array<i64: 1, 1, 32>}, {pipeline_mode = #tpu.pipeline_mode<synchronous>, transform_indices = @transform_8, window_bounds = array<i64: 1, 32, 64>}, {pipeline_mode = #tpu.pipeline_mode<synchronous>, transform_indices = @transform_9, window_bounds = array<i64: 1, 1, 64>}, {pipeline_mode = #tpu.pipeline_mode<synchronous>, transform_indices = @transform_10, window_bounds = array<i64: 1, 32, 32>}, {pipeline_mode = #tpu.pipeline_mode<synchronous>, transform_indices = @transform_11, window_bounds = array<i64: 1, 1, 32>}, {pipeline_mode = #tpu.pipeline_mode<synchronous>, transform_indices = @transform_12, window_bounds = array<i64: 1, 32, 64>}, {pipeline_mode = #tpu.pipeline_mode<synchronous>, transform_indices = @transform_13, window_bounds = array<i64: 1, 1, 64>}, {pipeline_mode = #tpu.pipeline_mode<synchronous>, transform_indices = @transform_14, window_bounds = array<i64: 1, 64, 32>}, {pipeline_mode = #tpu.pipeline_mode<synchronous>, transform_indices = @transform_15, window_bounds = array<i64: 1, 1, 32>}, {pipeline_mode = #tpu.pipeline_mode<synchronous>, transform_indices = @transform_16, window_bounds = array<i64: 1, 1, 32>}, {pipeline_mode = #tpu.pipeline_mode<synchronous>, transform_indices = @transform_17, window_bounds = array<i64: 1, 1, 32>}, {pipeline_mode = #tpu.pipeline_mode<synchronous>, transform_indices = @transform_18, window_bounds = array<i64: 1, 1, 32>}, {pipeline_mode = #tpu.pipeline_mode<synchronous>, transform_indices = @transform_19, window_bounds = array<i64: 1, 1, 32>}, {pipeline_mode = #tpu.pipeline_mode<synchronous>, transform_indices = @transform_20, window_bounds = array<i64: 1, 1, 32>}, {pipeline_mode = #tpu.pipeline_mode<synchronous>, transform_indices = @transform_21, window_bounds = array<i64: 1, 1, 32>}, {pipeline_mode = #tpu.pipeline_mode<synchronous>, transform_indices = @transform_22, window_bounds = array<i64: 1, 1, 32>}, {pipeline_mode = #tpu.pipeline_mode<synchronous>, transform_indices = @transform_23, window_bounds = array<i64: 1, 1, 32>}, {transform_indices = @transform_24, window_bounds = array<i64: 1, 8, 32>}, {transform_indices = @transform_25, window_bounds = array<i64: 1, 1, 32, 8>}, {transform_indices = @transform_26, window_bounds = array<i64: 1, 1, 32, 8>}]} {
    %c0_i32 = arith.constant 0 : i32
    %0 = arith.cmpi eq, %arg1, %c0_i32 : i32
    %1 = arith.extui %0 : i1 to i32
    %c0_i32_0 = arith.constant 0 : i32
    %2 = arith.cmpi ne, %1, %c0_i32_0 : i32
    scf.if %2 {
      %c0_102 = arith.constant 0 : index
      %c0_103 = arith.constant 0 : index
      %c0_104 = arith.constant 0 : index
      %278 = vector.load %arg2[%c0_102, %c0_103, %c0_104] : memref<1x8x32xf32, #tpu.memory_space<vmem>>, vector<1x8x32xf32>
      %279 = vector.shape_cast %278 : vector<1x8x32xf32> to vector<8x32xf32>
      %c0_105 = arith.constant 0 : index
      %c0_106 = arith.constant 0 : index
      %280 = vector.load %arg29[%c0_105, %c0_106] : memref<8x32xf32, #tpu.memory_space<vmem>>, vector<8x32xf32>
      tpu.vector_store %arg29[%c0_105, %c0_106], %279 {strides = array<i32>} : memref<8x32xf32, #tpu.memory_space<vmem>>, vector<8x32xf32>,
    } else {
    }
    %c0_i32_1 = arith.constant 0 : i32
    %3 = arith.cmpi eq, %arg1, %c0_i32_1 : i32
    %4 = arith.extui %3 : i1 to i32
    %c0_i32_2 = arith.constant 0 : i32
    %5 = arith.cmpi ne, %4, %c0_i32_2 : i32
    scf.if %5 {
      %c0_102 = arith.constant 0 : index
      %c0_103 = arith.constant 0 : index
      %c0_104 = arith.constant 0 : index
      %278 = vector.load %arg3[%c0_102, %c0_103, %c0_104] : memref<1x8x32xf32, #tpu.memory_space<vmem>>, vector<1x8x32xf32>
      %279 = vector.shape_cast %278 : vector<1x8x32xf32> to vector<8x32xf32>
      %280 = arith.truncf %279 : vector<8x32xf32> to vector<8x32xbf16>
      %c0_105 = arith.constant 0 : index
      %c0_106 = arith.constant 0 : index
      %c0_107 = arith.constant 0 : index
      %281 = vector.load %arg10[%c0_105, %c0_106, %c0_107] : memref<1x32x64xbf16, #tpu.memory_space<vmem>>, vector<1x32x64xbf16>
      %282 = vector.shape_cast %281 : vector<1x32x64xbf16> to vector<32x64xbf16>
      %cst_108 = arith.constant dense<0.000000e+00> : vector<8x64xf32>
      %283 = tpu.matmul %280, %282, %cst_108 {dimension_numbers = #tpu.dot_dimension_numbers<[1], [0], [0], [1], [0, 0, 1, 1], [], []>} : vector<8x32xbf16>, vector<32x64xbf16>, vector<8x64xf32> -> vector<8x64xf32>
      %c0_109 = arith.constant 0 : index
      %c0_110 = arith.constant 0 : index
      %c0_111 = arith.constant 0 : index
      %284 = vector.load %arg11[%c0_109, %c0_110, %c0_111] : memref<1x1x64xf32, #tpu.memory_space<vmem>>, vector<1x1x64xf32>
      %285 = vector.shape_cast %284 : vector<1x1x64xf32> to vector<1x64xf32>
      %286 = vector.broadcast %285 : vector<1x64xf32> to vector<8x64xf32>
      %287 = arith.addf %283, %286 : vector<8x64xf32>
      %c0_112 = arith.constant 0 : index
      %c0_113 = arith.constant 0 : index
      %288 = vector.load %arg30[%c0_112, %c0_113] : memref<8x64xf32, #tpu.memory_space<vmem>>, vector<8x64xf32>
      tpu.vector_store %arg30[%c0_112, %c0_113], %287 {strides = array<i32>} : memref<8x64xf32, #tpu.memory_space<vmem>>, vector<8x64xf32>,
    } else {
    }
    %c0 = arith.constant 0 : index
    %c0_3 = arith.constant 0 : index
    %6 = vector.load %arg29[%c0, %c0_3] : memref<8x32xf32, #tpu.memory_space<vmem>>, vector<8x32xf32>
    %7 = arith.truncf %6 : vector<8x32xf32> to vector<8x32xbf16>
    %c0_4 = arith.constant 0 : index
    %c0_5 = arith.constant 0 : index
    %c0_6 = arith.constant 0 : index
    %8 = vector.load %arg4[%c0_4, %c0_5, %c0_6] : memref<1x32x96xbf16, #tpu.memory_space<vmem>>, vector<1x32x96xbf16>
    %9 = vector.shape_cast %8 : vector<1x32x96xbf16> to vector<32x96xbf16>
    %cst = arith.constant dense<0.000000e+00> : vector<8x96xf32>
    %10 = tpu.matmul %7, %9, %cst {dimension_numbers = #tpu.dot_dimension_numbers<[1], [0], [0], [1], [0, 0, 1, 1], [], []>} : vector<8x32xbf16>, vector<32x96xbf16>, vector<8x96xf32> -> vector<8x96xf32>
    %c0_7 = arith.constant 0 : index
    %c0_8 = arith.constant 0 : index
    %c0_9 = arith.constant 0 : index
    %11 = vector.load %arg5[%c0_7, %c0_8, %c0_9] : memref<1x1x96xf32, #tpu.memory_space<vmem>>, vector<1x1x96xf32>
    %12 = vector.shape_cast %11 : vector<1x1x96xf32> to vector<1x96xf32>
    %13 = vector.broadcast %12 : vector<1x96xf32> to vector<8x96xf32>
    %14 = arith.addf %10, %13 : vector<8x96xf32>
    %15 = vector.extract_strided_slice %14 {offsets = [0, 0], sizes = [8, 32], strides = [1, 1]} : vector<8x96xf32> to vector<8x32xf32>
    %16 = vector.extract_strided_slice %14 {offsets = [0, 32], sizes = [8, 32], strides = [1, 1]} : vector<8x96xf32> to vector<8x32xf32>
    %17 = vector.extract_strided_slice %14 {offsets = [0, 64], sizes = [8, 32], strides = [1, 1]} : vector<8x96xf32> to vector<8x32xf32>
    %18 = vector.extract_strided_slice %15 {offsets = [0, 0], sizes = [8, 8], strides = [1, 1]} : vector<8x32xf32> to vector<8x8xf32>
    %19 = vector.extract_strided_slice %15 {offsets = [0, 8], sizes = [8, 8], strides = [1, 1]} : vector<8x32xf32> to vector<8x8xf32>
    %20 = vector.extract_strided_slice %15 {offsets = [0, 16], sizes = [8, 8], strides = [1, 1]} : vector<8x32xf32> to vector<8x8xf32>
    %21 = vector.extract_strided_slice %15 {offsets = [0, 24], sizes = [8, 8], strides = [1, 1]} : vector<8x32xf32> to vector<8x8xf32>
    %22 = vector.shape_cast %18 : vector<8x8xf32> to vector<1x8x8xf32>
    %23 = vector.shape_cast %19 : vector<8x8xf32> to vector<1x8x8xf32>
    %24 = vector.shape_cast %20 : vector<8x8xf32> to vector<1x8x8xf32>
    %25 = vector.shape_cast %21 : vector<8x8xf32> to vector<1x8x8xf32>
    %26 = tpu.concatenate %22, %23, %24, %25 in 0 : vector<1x8x8xf32>, vector<1x8x8xf32>, vector<1x8x8xf32>, vector<1x8x8xf32> -> vector<4x8x8xf32>
    %27 = arith.truncf %26 : vector<4x8x8xf32> to vector<4x8x8xbf16>
    %28 = vector.extract_strided_slice %16 {offsets = [0, 0], sizes = [8, 8], strides = [1, 1]} : vector<8x32xf32> to vector<8x8xf32>
    %29 = vector.extract_strided_slice %16 {offsets = [0, 8], sizes = [8, 8], strides = [1, 1]} : vector<8x32xf32> to vector<8x8xf32>
    %30 = vector.extract_strided_slice %16 {offsets = [0, 16], sizes = [8, 8], strides = [1, 1]} : vector<8x32xf32> to vector<8x8xf32>
    %31 = vector.extract_strided_slice %16 {offsets = [0, 24], sizes = [8, 8], strides = [1, 1]} : vector<8x32xf32> to vector<8x8xf32>
    %32 = vector.shape_cast %28 : vector<8x8xf32> to vector<1x8x8xf32>
    %33 = vector.shape_cast %29 : vector<8x8xf32> to vector<1x8x8xf32>
    %34 = vector.shape_cast %30 : vector<8x8xf32> to vector<1x8x8xf32>
    %35 = vector.shape_cast %31 : vector<8x8xf32> to vector<1x8x8xf32>
    %36 = tpu.concatenate %32, %33, %34, %35 in 0 : vector<1x8x8xf32>, vector<1x8x8xf32>, vector<1x8x8xf32>, vector<1x8x8xf32> -> vector<4x8x8xf32>
    %37 = arith.truncf %36 : vector<4x8x8xf32> to vector<4x8x8xbf16>
    %38 = vector.extract_strided_slice %17 {offsets = [0, 0], sizes = [8, 8], strides = [1, 1]} : vector<8x32xf32> to vector<8x8xf32>
    %39 = vector.extract_strided_slice %17 {offsets = [0, 8], sizes = [8, 8], strides = [1, 1]} : vector<8x32xf32> to vector<8x8xf32>
    %40 = vector.extract_strided_slice %17 {offsets = [0, 16], sizes = [8, 8], strides = [1, 1]} : vector<8x32xf32> to vector<8x8xf32>
    %41 = vector.extract_strided_slice %17 {offsets = [0, 24], sizes = [8, 8], strides = [1, 1]} : vector<8x32xf32> to vector<8x8xf32>
    %42 = vector.shape_cast %38 : vector<8x8xf32> to vector<1x8x8xf32>
    %43 = vector.shape_cast %39 : vector<8x8xf32> to vector<1x8x8xf32>
    %44 = vector.shape_cast %40 : vector<8x8xf32> to vector<1x8x8xf32>
    %45 = vector.shape_cast %41 : vector<8x8xf32> to vector<1x8x8xf32>
    %46 = tpu.concatenate %42, %43, %44, %45 in 0 : vector<1x8x8xf32>, vector<1x8x8xf32>, vector<1x8x8xf32>, vector<1x8x8xf32> -> vector<4x8x8xf32>
    %47 = arith.truncf %46 : vector<4x8x8xf32> to vector<4x8x8xbf16>
    "tpu.trace_start"() <{level = 10 : i32, message = "hqd,hkd->hqk"}> : () -> ()
    %cst_10 = arith.constant dense<0.000000e+00> : vector<4x8x8xf32>
    %48 = tpu.matmul %27, %37, %cst_10 {dimension_numbers = #tpu.dot_dimension_numbers<[2], [2], [1], [1], [0, 0, 0, 1, 1, 1], [0], [0]>} : vector<4x8x8xbf16>, vector<4x8x8xbf16>, vector<4x8x8xf32> -> vector<4x8x8xf32>
    "tpu.trace_stop"() : () -> ()
    %cst_11 = arith.constant dense<0xFF800000> : vector<4x8xf32>
    %49 = vector.multi_reduction <maximumf>, %48, %cst_11 [2] : vector<4x8x8xf32> to vector<4x8xf32>
    %50 = vector.shape_cast %49 : vector<4x8xf32> to vector<4x8x1xf32>
    %51 = vector.broadcast %50 : vector<4x8x1xf32> to vector<4x8x8xf32>
    %52 = arith.subf %48, %51 : vector<4x8x8xf32>
    %53 = math.exp %52 : vector<4x8x8xf32>
    %cst_12 = arith.constant dense<0.000000e+00> : vector<4x8xf32>
    %54 = vector.multi_reduction <add>, %53, %cst_12 [2] : vector<4x8x8xf32> to vector<4x8xf32>
    %55 = vector.shape_cast %54 : vector<4x8xf32> to vector<4x8x1xf32>
    %cst_13 = arith.constant 1.000000e+00 : f32
    %56 = vector.broadcast %cst_13 : f32 to vector<4x8x1xf32>
    %57 = arith.divf %56, %55 : vector<4x8x1xf32>
    %58 = vector.broadcast %57 : vector<4x8x1xf32> to vector<4x8x8xf32>
    %59 = arith.mulf %53, %58 : vector<4x8x8xf32>
    %60 = vector.extract_strided_slice %59 {offsets = [0, 0, 0], sizes = [1, 8, 8], strides = [1, 1, 1]} : vector<4x8x8xf32> to vector<1x8x8xf32>
    %61 = vector.shape_cast %60 : vector<1x8x8xf32> to vector<8x8xf32>
    %62 = vector.extract_strided_slice %59 {offsets = [1, 0, 0], sizes = [1, 8, 8], strides = [1, 1, 1]} : vector<4x8x8xf32> to vector<1x8x8xf32>
    %63 = vector.shape_cast %62 : vector<1x8x8xf32> to vector<8x8xf32>
    %64 = vector.extract_strided_slice %59 {offsets = [2, 0, 0], sizes = [1, 8, 8], strides = [1, 1, 1]} : vector<4x8x8xf32> to vector<1x8x8xf32>
    %65 = vector.shape_cast %64 : vector<1x8x8xf32> to vector<8x8xf32>
    %66 = vector.extract_strided_slice %59 {offsets = [3, 0, 0], sizes = [1, 8, 8], strides = [1, 1, 1]} : vector<4x8x8xf32> to vector<1x8x8xf32>
    %67 = vector.shape_cast %66 : vector<1x8x8xf32> to vector<8x8xf32>
    %68 = tpu.concatenate %61, %63, %65, %67 in 0 : vector<8x8xf32>, vector<8x8xf32>, vector<8x8xf32>, vector<8x8xf32> -> vector<32x8xf32>
    %c0_14 = arith.constant 0 : index
    %c0_15 = arith.constant 0 : index
    %c0_16 = arith.constant 0 : index
    %c0_17 = arith.constant 0 : index
    %69 = vector.load %arg27[%c0_14, %c0_15, %c0_16, %c0_17] : memref<1x1x32x8xf32, #tpu.memory_space<vmem>>, vector<1x1x32x8xf32>
    %70 = vector.shape_cast %69 : vector<1x1x32x8xf32> to vector<32x8xf32>
    %71 = vector.shape_cast %68 : vector<32x8xf32> to vector<1x1x32x8xf32>
    tpu.vector_store %arg27[%c0_14, %c0_15, %c0_16, %c0_17], %71 {strides = array<i32>} : memref<1x1x32x8xf32, #tpu.memory_space<vmem>>, vector<1x1x32x8xf32>,
    %72 = arith.truncf %59 : vector<4x8x8xf32> to vector<4x8x8xbf16>
    "tpu.trace_start"() <{level = 10 : i32, message = "hqk,hkd->hqd"}> : () -> ()
    %cst_18 = arith.constant dense<0.000000e+00> : vector<4x8x8xf32>
    %73 = tpu.matmul %72, %47, %cst_18 {dimension_numbers = #tpu.dot_dimension_numbers<[2], [1], [1], [2], [0, 0, 0, 1, 1, 2], [0], [0]>} : vector<4x8x8xbf16>, vector<4x8x8xbf16>, vector<4x8x8xf32> -> vector<4x8x8xf32>
    "tpu.trace_stop"() : () -> ()
    %74 = vector.extract_strided_slice %73 {offsets = [0, 0, 0], sizes = [1, 8, 8], strides = [1, 1, 1]} : vector<4x8x8xf32> to vector<1x8x8xf32>
    %75 = vector.shape_cast %74 : vector<1x8x8xf32> to vector<8x8xf32>
    %76 = vector.extract_strided_slice %73 {offsets = [1, 0, 0], sizes = [1, 8, 8], strides = [1, 1, 1]} : vector<4x8x8xf32> to vector<1x8x8xf32>
    %77 = vector.shape_cast %76 : vector<1x8x8xf32> to vector<8x8xf32>
    %78 = vector.extract_strided_slice %73 {offsets = [2, 0, 0], sizes = [1, 8, 8], strides = [1, 1, 1]} : vector<4x8x8xf32> to vector<1x8x8xf32>
    %79 = vector.shape_cast %78 : vector<1x8x8xf32> to vector<8x8xf32>
    %80 = vector.extract_strided_slice %73 {offsets = [3, 0, 0], sizes = [1, 8, 8], strides = [1, 1, 1]} : vector<4x8x8xf32> to vector<1x8x8xf32>
    %81 = vector.shape_cast %80 : vector<1x8x8xf32> to vector<8x8xf32>
    %82 = tpu.concatenate %75, %77, %79, %81 in 1 : vector<8x8xf32>, vector<8x8xf32>, vector<8x8xf32>, vector<8x8xf32> -> vector<8x32xf32>
    %83 = arith.truncf %82 : vector<8x32xf32> to vector<8x32xbf16>
    %c0_19 = arith.constant 0 : index
    %c0_20 = arith.constant 0 : index
    %c0_21 = arith.constant 0 : index
    %84 = vector.load %arg6[%c0_19, %c0_20, %c0_21] : memref<1x32x32xbf16, #tpu.memory_space<vmem>>, vector<1x32x32xbf16>
    %85 = vector.shape_cast %84 : vector<1x32x32xbf16> to vector<32x32xbf16>
    %cst_22 = arith.constant dense<0.000000e+00> : vector<8x32xf32>
    %86 = tpu.matmul %83, %85, %cst_22 {dimension_numbers = #tpu.dot_dimension_numbers<[1], [0], [0], [1], [0, 0, 1, 1], [], []>} : vector<8x32xbf16>, vector<32x32xbf16>, vector<8x32xf32> -> vector<8x32xf32>
    %c0_23 = arith.constant 0 : index
    %c0_24 = arith.constant 0 : index
    %c0_25 = arith.constant 0 : index
    %87 = vector.load %arg7[%c0_23, %c0_24, %c0_25] : memref<1x1x32xf32, #tpu.memory_space<vmem>>, vector<1x1x32xf32>
    %88 = vector.shape_cast %87 : vector<1x1x32xf32> to vector<1x32xf32>
    %89 = vector.broadcast %88 : vector<1x32xf32> to vector<8x32xf32>
    %90 = arith.addf %86, %89 : vector<8x32xf32>
    %91 = arith.addf %6, %90 : vector<8x32xf32>
    %c0_26 = arith.constant 0 : index
    %c0_27 = arith.constant 0 : index
    %c0_28 = arith.constant 0 : index
    %92 = vector.load %arg18[%c0_26, %c0_27, %c0_28] : memref<1x1x32xf32, #tpu.memory_space<vmem>>, vector<1x1x32xf32>
    %93 = vector.shape_cast %92 : vector<1x1x32xf32> to vector<1x32xf32>
    %c0_29 = arith.constant 0 : index
    %c0_30 = arith.constant 0 : index
    %c0_31 = arith.constant 0 : index
    %94 = vector.load %arg19[%c0_29, %c0_30, %c0_31] : memref<1x1x32xf32, #tpu.memory_space<vmem>>, vector<1x1x32xf32>
    %95 = vector.shape_cast %94 : vector<1x1x32xf32> to vector<1x32xf32>
    %cst_32 = arith.constant dense<0.000000e+00> : vector<8xf32>
    %96 = vector.multi_reduction <add>, %91, %cst_32 [1] : vector<8x32xf32> to vector<8xf32>
    %97 = vector.shape_cast %96 : vector<8xf32> to vector<8x1xf32>
    %cst_33 = arith.constant 3.200000e+01 : f32
    %98 = vector.broadcast %cst_33 : f32 to vector<8x1xf32>
    %99 = arith.divf %97, %98 : vector<8x1xf32>
    %100 = vector.broadcast %99 : vector<8x1xf32> to vector<8x32xf32>
    %101 = arith.subf %91, %100 : vector<8x32xf32>
    %102 = arith.mulf %101, %101 : vector<8x32xf32>
    %cst_34 = arith.constant dense<0.000000e+00> : vector<8xf32>
    %103 = vector.multi_reduction <add>, %102, %cst_34 [1] : vector<8x32xf32> to vector<8xf32>
    %104 = vector.shape_cast %103 : vector<8xf32> to vector<8x1xf32>
    %cst_35 = arith.constant 3.200000e+01 : f32
    %105 = vector.broadcast %cst_35 : f32 to vector<8x1xf32>
    %106 = arith.divf %104, %105 : vector<8x1xf32>
    %107 = vector.broadcast %99 : vector<8x1xf32> to vector<8x32xf32>
    %108 = arith.subf %91, %107 : vector<8x32xf32>
    %cst_36 = arith.constant 9.99999974E-6 : f32
    %109 = vector.broadcast %cst_36 : f32 to vector<8x1xf32>
    %110 = arith.addf %106, %109 : vector<8x1xf32>
    %111 = math.rsqrt %110 : vector<8x1xf32>
    %112 = vector.broadcast %111 : vector<8x1xf32> to vector<8x32xf32>
    %113 = arith.mulf %108, %112 : vector<8x32xf32>
    %114 = vector.broadcast %93 : vector<1x32xf32> to vector<8x32xf32>
    %115 = arith.mulf %113, %114 : vector<8x32xf32>
    %116 = vector.broadcast %95 : vector<1x32xf32> to vector<8x32xf32>
    %117 = arith.addf %115, %116 : vector<8x32xf32>
    %118 = arith.truncf %117 : vector<8x32xf32> to vector<8x32xbf16>
    %c0_37 = arith.constant 0 : index
    %c0_38 = arith.constant 0 : index
    %c0_39 = arith.constant 0 : index
    %119 = vector.load %arg8[%c0_37, %c0_38, %c0_39] : memref<1x32x32xbf16, #tpu.memory_space<vmem>>, vector<1x32x32xbf16>
    %120 = vector.shape_cast %119 : vector<1x32x32xbf16> to vector<32x32xbf16>
    %cst_40 = arith.constant dense<0.000000e+00> : vector<8x32xf32>
    %121 = tpu.matmul %118, %120, %cst_40 {dimension_numbers = #tpu.dot_dimension_numbers<[1], [0], [0], [1], [0, 0, 1, 1], [], []>} : vector<8x32xbf16>, vector<32x32xbf16>, vector<8x32xf32> -> vector<8x32xf32>
    %c0_41 = arith.constant 0 : index
    %c0_42 = arith.constant 0 : index
    %c0_43 = arith.constant 0 : index
    %122 = vector.load %arg9[%c0_41, %c0_42, %c0_43] : memref<1x1x32xf32, #tpu.memory_space<vmem>>, vector<1x1x32xf32>
    %123 = vector.shape_cast %122 : vector<1x1x32xf32> to vector<1x32xf32>
    %124 = vector.broadcast %123 : vector<1x32xf32> to vector<8x32xf32>
    %125 = arith.addf %121, %124 : vector<8x32xf32>
    %c0_44 = arith.constant 0 : index
    %c0_45 = arith.constant 0 : index
    %126 = vector.load %arg30[%c0_44, %c0_45] : memref<8x64xf32, #tpu.memory_space<vmem>>, vector<8x64xf32>
    %127 = vector.extract_strided_slice %126 {offsets = [0, 0], sizes = [8, 32], strides = [1, 1]} : vector<8x64xf32> to vector<8x32xf32>
    %128 = vector.extract_strided_slice %126 {offsets = [0, 32], sizes = [8, 32], strides = [1, 1]} : vector<8x64xf32> to vector<8x32xf32>
    %129 = vector.extract_strided_slice %125 {offsets = [0, 0], sizes = [8, 8], strides = [1, 1]} : vector<8x32xf32> to vector<8x8xf32>
    %130 = vector.extract_strided_slice %125 {offsets = [0, 8], sizes = [8, 8], strides = [1, 1]} : vector<8x32xf32> to vector<8x8xf32>
    %131 = vector.extract_strided_slice %125 {offsets = [0, 16], sizes = [8, 8], strides = [1, 1]} : vector<8x32xf32> to vector<8x8xf32>
    %132 = vector.extract_strided_slice %125 {offsets = [0, 24], sizes = [8, 8], strides = [1, 1]} : vector<8x32xf32> to vector<8x8xf32>
    %133 = vector.shape_cast %129 : vector<8x8xf32> to vector<1x8x8xf32>
    %134 = vector.shape_cast %130 : vector<8x8xf32> to vector<1x8x8xf32>
    %135 = vector.shape_cast %131 : vector<8x8xf32> to vector<1x8x8xf32>
    %136 = vector.shape_cast %132 : vector<8x8xf32> to vector<1x8x8xf32>
    %137 = tpu.concatenate %133, %134, %135, %136 in 0 : vector<1x8x8xf32>, vector<1x8x8xf32>, vector<1x8x8xf32>, vector<1x8x8xf32> -> vector<4x8x8xf32>
    %138 = arith.truncf %137 : vector<4x8x8xf32> to vector<4x8x8xbf16>
    %139 = vector.extract_strided_slice %127 {offsets = [0, 0], sizes = [8, 8], strides = [1, 1]} : vector<8x32xf32> to vector<8x8xf32>
    %140 = vector.extract_strided_slice %127 {offsets = [0, 8], sizes = [8, 8], strides = [1, 1]} : vector<8x32xf32> to vector<8x8xf32>
    %141 = vector.extract_strided_slice %127 {offsets = [0, 16], sizes = [8, 8], strides = [1, 1]} : vector<8x32xf32> to vector<8x8xf32>
    %142 = vector.extract_strided_slice %127 {offsets = [0, 24], sizes = [8, 8], strides = [1, 1]} : vector<8x32xf32> to vector<8x8xf32>
    %143 = vector.shape_cast %139 : vector<8x8xf32> to vector<1x8x8xf32>
    %144 = vector.shape_cast %140 : vector<8x8xf32> to vector<1x8x8xf32>
    %145 = vector.shape_cast %141 : vector<8x8xf32> to vector<1x8x8xf32>
    %146 = vector.shape_cast %142 : vector<8x8xf32> to vector<1x8x8xf32>
    %147 = tpu.concatenate %143, %144, %145, %146 in 0 : vector<1x8x8xf32>, vector<1x8x8xf32>, vector<1x8x8xf32>, vector<1x8x8xf32> -> vector<4x8x8xf32>
    %148 = arith.truncf %147 : vector<4x8x8xf32> to vector<4x8x8xbf16>
    %149 = vector.extract_strided_slice %128 {offsets = [0, 0], sizes = [8, 8], strides = [1, 1]} : vector<8x32xf32> to vector<8x8xf32>
    %150 = vector.extract_strided_slice %128 {offsets = [0, 8], sizes = [8, 8], strides = [1, 1]} : vector<8x32xf32> to vector<8x8xf32>
    %151 = vector.extract_strided_slice %128 {offsets = [0, 16], sizes = [8, 8], strides = [1, 1]} : vector<8x32xf32> to vector<8x8xf32>
    %152 = vector.extract_strided_slice %128 {offsets = [0, 24], sizes = [8, 8], strides = [1, 1]} : vector<8x32xf32> to vector<8x8xf32>
    %153 = vector.shape_cast %149 : vector<8x8xf32> to vector<1x8x8xf32>
    %154 = vector.shape_cast %150 : vector<8x8xf32> to vector<1x8x8xf32>
    %155 = vector.shape_cast %151 : vector<8x8xf32> to vector<1x8x8xf32>
    %156 = vector.shape_cast %152 : vector<8x8xf32> to vector<1x8x8xf32>
    %157 = tpu.concatenate %153, %154, %155, %156 in 0 : vector<1x8x8xf32>, vector<1x8x8xf32>, vector<1x8x8xf32>, vector<1x8x8xf32> -> vector<4x8x8xf32>
    %158 = arith.truncf %157 : vector<4x8x8xf32> to vector<4x8x8xbf16>
    "tpu.trace_start"() <{level = 10 : i32, message = "hqd,hkd->hqk"}> : () -> ()
    %cst_46 = arith.constant dense<0.000000e+00> : vector<4x8x8xf32>
    %159 = tpu.matmul %138, %148, %cst_46 {dimension_numbers = #tpu.dot_dimension_numbers<[2], [2], [1], [1], [0, 0, 0, 1, 1, 1], [0], [0]>} : vector<4x8x8xbf16>, vector<4x8x8xbf16>, vector<4x8x8xf32> -> vector<4x8x8xf32>
    "tpu.trace_stop"() : () -> ()
    %cst_47 = arith.constant dense<0xFF800000> : vector<4x8xf32>
    %160 = vector.multi_reduction <maximumf>, %159, %cst_47 [2] : vector<4x8x8xf32> to vector<4x8xf32>
    %161 = vector.shape_cast %160 : vector<4x8xf32> to vector<4x8x1xf32>
    %162 = vector.broadcast %161 : vector<4x8x1xf32> to vector<4x8x8xf32>
    %163 = arith.subf %159, %162 : vector<4x8x8xf32>
    %164 = math.exp %163 : vector<4x8x8xf32>
    %cst_48 = arith.constant dense<0.000000e+00> : vector<4x8xf32>
    %165 = vector.multi_reduction <add>, %164, %cst_48 [2] : vector<4x8x8xf32> to vector<4x8xf32>
    %166 = vector.shape_cast %165 : vector<4x8xf32> to vector<4x8x1xf32>
    %cst_49 = arith.constant 1.000000e+00 : f32
    %167 = vector.broadcast %cst_49 : f32 to vector<4x8x1xf32>
    %168 = arith.divf %167, %166 : vector<4x8x1xf32>
    %169 = vector.broadcast %168 : vector<4x8x1xf32> to vector<4x8x8xf32>
    %170 = arith.mulf %164, %169 : vector<4x8x8xf32>
    %171 = vector.extract_strided_slice %170 {offsets = [0, 0, 0], sizes = [1, 8, 8], strides = [1, 1, 1]} : vector<4x8x8xf32> to vector<1x8x8xf32>
    %172 = vector.shape_cast %171 : vector<1x8x8xf32> to vector<8x8xf32>
    %173 = vector.extract_strided_slice %170 {offsets = [1, 0, 0], sizes = [1, 8, 8], strides = [1, 1, 1]} : vector<4x8x8xf32> to vector<1x8x8xf32>
    %174 = vector.shape_cast %173 : vector<1x8x8xf32> to vector<8x8xf32>
    %175 = vector.extract_strided_slice %170 {offsets = [2, 0, 0], sizes = [1, 8, 8], strides = [1, 1, 1]} : vector<4x8x8xf32> to vector<1x8x8xf32>
    %176 = vector.shape_cast %175 : vector<1x8x8xf32> to vector<8x8xf32>
    %177 = vector.extract_strided_slice %170 {offsets = [3, 0, 0], sizes = [1, 8, 8], strides = [1, 1, 1]} : vector<4x8x8xf32> to vector<1x8x8xf32>
    %178 = vector.shape_cast %177 : vector<1x8x8xf32> to vector<8x8xf32>
    %179 = tpu.concatenate %172, %174, %176, %178 in 0 : vector<8x8xf32>, vector<8x8xf32>, vector<8x8xf32>, vector<8x8xf32> -> vector<32x8xf32>
    %c0_50 = arith.constant 0 : index
    %c0_51 = arith.constant 0 : index
    %c0_52 = arith.constant 0 : index
    %c0_53 = arith.constant 0 : index
    %180 = vector.load %arg28[%c0_50, %c0_51, %c0_52, %c0_53] : memref<1x1x32x8xf32, #tpu.memory_space<vmem>>, vector<1x1x32x8xf32>
    %181 = vector.shape_cast %180 : vector<1x1x32x8xf32> to vector<32x8xf32>
    %182 = vector.shape_cast %179 : vector<32x8xf32> to vector<1x1x32x8xf32>
    tpu.vector_store %arg28[%c0_50, %c0_51, %c0_52, %c0_53], %182 {strides = array<i32>} : memref<1x1x32x8xf32, #tpu.memory_space<vmem>>, vector<1x1x32x8xf32>,
    %183 = arith.truncf %170 : vector<4x8x8xf32> to vector<4x8x8xbf16>
    "tpu.trace_start"() <{level = 10 : i32, message = "hqk,hkd->hqd"}> : () -> ()
    %cst_54 = arith.constant dense<0.000000e+00> : vector<4x8x8xf32>
    %184 = tpu.matmul %183, %158, %cst_54 {dimension_numbers = #tpu.dot_dimension_numbers<[2], [1], [1], [2], [0, 0, 0, 1, 1, 2], [0], [0]>} : vector<4x8x8xbf16>, vector<4x8x8xbf16>, vector<4x8x8xf32> -> vector<4x8x8xf32>
    "tpu.trace_stop"() : () -> ()
    %185 = vector.extract_strided_slice %184 {offsets = [0, 0, 0], sizes = [1, 8, 8], strides = [1, 1, 1]} : vector<4x8x8xf32> to vector<1x8x8xf32>
    %186 = vector.shape_cast %185 : vector<1x8x8xf32> to vector<8x8xf32>
    %187 = vector.extract_strided_slice %184 {offsets = [1, 0, 0], sizes = [1, 8, 8], strides = [1, 1, 1]} : vector<4x8x8xf32> to vector<1x8x8xf32>
    %188 = vector.shape_cast %187 : vector<1x8x8xf32> to vector<8x8xf32>
    %189 = vector.extract_strided_slice %184 {offsets = [2, 0, 0], sizes = [1, 8, 8], strides = [1, 1, 1]} : vector<4x8x8xf32> to vector<1x8x8xf32>
    %190 = vector.shape_cast %189 : vector<1x8x8xf32> to vector<8x8xf32>
    %191 = vector.extract_strided_slice %184 {offsets = [3, 0, 0], sizes = [1, 8, 8], strides = [1, 1, 1]} : vector<4x8x8xf32> to vector<1x8x8xf32>
    %192 = vector.shape_cast %191 : vector<1x8x8xf32> to vector<8x8xf32>
    %193 = tpu.concatenate %186, %188, %190, %192 in 1 : vector<8x8xf32>, vector<8x8xf32>, vector<8x8xf32>, vector<8x8xf32> -> vector<8x32xf32>
    %194 = arith.truncf %193 : vector<8x32xf32> to vector<8x32xbf16>
    %c0_55 = arith.constant 0 : index
    %c0_56 = arith.constant 0 : index
    %c0_57 = arith.constant 0 : index
    %195 = vector.load %arg12[%c0_55, %c0_56, %c0_57] : memref<1x32x32xbf16, #tpu.memory_space<vmem>>, vector<1x32x32xbf16>
    %196 = vector.shape_cast %195 : vector<1x32x32xbf16> to vector<32x32xbf16>
    %cst_58 = arith.constant dense<0.000000e+00> : vector<8x32xf32>
    %197 = tpu.matmul %194, %196, %cst_58 {dimension_numbers = #tpu.dot_dimension_numbers<[1], [0], [0], [1], [0, 0, 1, 1], [], []>} : vector<8x32xbf16>, vector<32x32xbf16>, vector<8x32xf32> -> vector<8x32xf32>
    %c0_59 = arith.constant 0 : index
    %c0_60 = arith.constant 0 : index
    %c0_61 = arith.constant 0 : index
    %198 = vector.load %arg13[%c0_59, %c0_60, %c0_61] : memref<1x1x32xf32, #tpu.memory_space<vmem>>, vector<1x1x32xf32>
    %199 = vector.shape_cast %198 : vector<1x1x32xf32> to vector<1x32xf32>
    %200 = vector.broadcast %199 : vector<1x32xf32> to vector<8x32xf32>
    %201 = arith.addf %197, %200 : vector<8x32xf32>
    %202 = arith.addf %117, %201 : vector<8x32xf32>
    %c0_62 = arith.constant 0 : index
    %c0_63 = arith.constant 0 : index
    %c0_64 = arith.constant 0 : index
    %203 = vector.load %arg20[%c0_62, %c0_63, %c0_64] : memref<1x1x32xf32, #tpu.memory_space<vmem>>, vector<1x1x32xf32>
    %204 = vector.shape_cast %203 : vector<1x1x32xf32> to vector<1x32xf32>
    %c0_65 = arith.constant 0 : index
    %c0_66 = arith.constant 0 : index
    %c0_67 = arith.constant 0 : index
    %205 = vector.load %arg21[%c0_65, %c0_66, %c0_67] : memref<1x1x32xf32, #tpu.memory_space<vmem>>, vector<1x1x32xf32>
    %206 = vector.shape_cast %205 : vector<1x1x32xf32> to vector<1x32xf32>
    %cst_68 = arith.constant dense<0.000000e+00> : vector<8xf32>
    %207 = vector.multi_reduction <add>, %202, %cst_68 [1] : vector<8x32xf32> to vector<8xf32>
    %208 = vector.shape_cast %207 : vector<8xf32> to vector<8x1xf32>
    %cst_69 = arith.constant 3.200000e+01 : f32
    %209 = vector.broadcast %cst_69 : f32 to vector<8x1xf32>
    %210 = arith.divf %208, %209 : vector<8x1xf32>
    %211 = vector.broadcast %210 : vector<8x1xf32> to vector<8x32xf32>
    %212 = arith.subf %202, %211 : vector<8x32xf32>
    %213 = arith.mulf %212, %212 : vector<8x32xf32>
    %cst_70 = arith.constant dense<0.000000e+00> : vector<8xf32>
    %214 = vector.multi_reduction <add>, %213, %cst_70 [1] : vector<8x32xf32> to vector<8xf32>
    %215 = vector.shape_cast %214 : vector<8xf32> to vector<8x1xf32>
    %cst_71 = arith.constant 3.200000e+01 : f32
    %216 = vector.broadcast %cst_71 : f32 to vector<8x1xf32>
    %217 = arith.divf %215, %216 : vector<8x1xf32>
    %218 = vector.broadcast %210 : vector<8x1xf32> to vector<8x32xf32>
    %219 = arith.subf %202, %218 : vector<8x32xf32>
    %cst_72 = arith.constant 9.99999974E-6 : f32
    %220 = vector.broadcast %cst_72 : f32 to vector<8x1xf32>
    %221 = arith.addf %217, %220 : vector<8x1xf32>
    %222 = math.rsqrt %221 : vector<8x1xf32>
    %223 = vector.broadcast %222 : vector<8x1xf32> to vector<8x32xf32>
    %224 = arith.mulf %219, %223 : vector<8x32xf32>
    %225 = vector.broadcast %204 : vector<1x32xf32> to vector<8x32xf32>
    %226 = arith.mulf %224, %225 : vector<8x32xf32>
    %227 = vector.broadcast %206 : vector<1x32xf32> to vector<8x32xf32>
    %228 = arith.addf %226, %227 : vector<8x32xf32>
    %229 = arith.truncf %228 : vector<8x32xf32> to vector<8x32xbf16>
    %c0_73 = arith.constant 0 : index
    %c0_74 = arith.constant 0 : index
    %c0_75 = arith.constant 0 : index
    %230 = vector.load %arg14[%c0_73, %c0_74, %c0_75] : memref<1x32x64xbf16, #tpu.memory_space<vmem>>, vector<1x32x64xbf16>
    %231 = vector.shape_cast %230 : vector<1x32x64xbf16> to vector<32x64xbf16>
    %cst_76 = arith.constant dense<0.000000e+00> : vector<8x64xf32>
    %232 = tpu.matmul %229, %231, %cst_76 {dimension_numbers = #tpu.dot_dimension_numbers<[1], [0], [0], [1], [0, 0, 1, 1], [], []>} : vector<8x32xbf16>, vector<32x64xbf16>, vector<8x64xf32> -> vector<8x64xf32>
    %c0_77 = arith.constant 0 : index
    %c0_78 = arith.constant 0 : index
    %c0_79 = arith.constant 0 : index
    %233 = vector.load %arg15[%c0_77, %c0_78, %c0_79] : memref<1x1x64xf32, #tpu.memory_space<vmem>>, vector<1x1x64xf32>
    %234 = vector.shape_cast %233 : vector<1x1x64xf32> to vector<1x64xf32>
    %235 = vector.broadcast %234 : vector<1x64xf32> to vector<8x64xf32>
    %236 = arith.addf %232, %235 : vector<8x64xf32>
    %cst_80 = arith.constant 0.000000e+00 : f32
    %237 = vector.broadcast %cst_80 : f32 to vector<8x64xf32>
    %238 = arith.maximumf %236, %237 : vector<8x64xf32>
    %239 = arith.truncf %238 : vector<8x64xf32> to vector<8x64xbf16>
    %c0_81 = arith.constant 0 : index
    %c0_82 = arith.constant 0 : index
    %c0_83 = arith.constant 0 : index
    %240 = vector.load %arg16[%c0_81, %c0_82, %c0_83] : memref<1x64x32xbf16, #tpu.memory_space<vmem>>, vector<1x64x32xbf16>
    %241 = vector.shape_cast %240 : vector<1x64x32xbf16> to vector<64x32xbf16>
    %cst_84 = arith.constant dense<0.000000e+00> : vector<8x32xf32>
    %242 = tpu.matmul %239, %241, %cst_84 {dimension_numbers = #tpu.dot_dimension_numbers<[1], [0], [0], [1], [0, 0, 1, 1], [], []>} : vector<8x64xbf16>, vector<64x32xbf16>, vector<8x32xf32> -> vector<8x32xf32>
    %c0_85 = arith.constant 0 : index
    %c0_86 = arith.constant 0 : index
    %c0_87 = arith.constant 0 : index
    %243 = vector.load %arg17[%c0_85, %c0_86, %c0_87] : memref<1x1x32xf32, #tpu.memory_space<vmem>>, vector<1x1x32xf32>
    %244 = vector.shape_cast %243 : vector<1x1x32xf32> to vector<1x32xf32>
    %245 = vector.broadcast %244 : vector<1x32xf32> to vector<8x32xf32>
    %246 = arith.addf %242, %245 : vector<8x32xf32>
    %247 = arith.addf %228, %246 : vector<8x32xf32>
    %c0_88 = arith.constant 0 : index
    %c0_89 = arith.constant 0 : index
    %c0_90 = arith.constant 0 : index
    %248 = vector.load %arg22[%c0_88, %c0_89, %c0_90] : memref<1x1x32xf32, #tpu.memory_space<vmem>>, vector<1x1x32xf32>
    %249 = vector.shape_cast %248 : vector<1x1x32xf32> to vector<1x32xf32>
    %c0_91 = arith.constant 0 : index
    %c0_92 = arith.constant 0 : index
    %c0_93 = arith.constant 0 : index
    %250 = vector.load %arg23[%c0_91, %c0_92, %c0_93] : memref<1x1x32xf32, #tpu.memory_space<vmem>>, vector<1x1x32xf32>
    %251 = vector.shape_cast %250 : vector<1x1x32xf32> to vector<1x32xf32>
    %cst_94 = arith.constant dense<0.000000e+00> : vector<8xf32>
    %252 = vector.multi_reduction <add>, %247, %cst_94 [1] : vector<8x32xf32> to vector<8xf32>
    %253 = vector.shape_cast %252 : vector<8xf32> to vector<8x1xf32>
    %cst_95 = arith.constant 3.200000e+01 : f32
    %254 = vector.broadcast %cst_95 : f32 to vector<8x1xf32>
    %255 = arith.divf %253, %254 : vector<8x1xf32>
    %256 = vector.broadcast %255 : vector<8x1xf32> to vector<8x32xf32>
    %257 = arith.subf %247, %256 : vector<8x32xf32>
    %258 = arith.mulf %257, %257 : vector<8x32xf32>
    %cst_96 = arith.constant dense<0.000000e+00> : vector<8xf32>
    %259 = vector.multi_reduction <add>, %258, %cst_96 [1] : vector<8x32xf32> to vector<8xf32>
    %260 = vector.shape_cast %259 : vector<8xf32> to vector<8x1xf32>
    %cst_97 = arith.constant 3.200000e+01 : f32
    %261 = vector.broadcast %cst_97 : f32 to vector<8x1xf32>
    %262 = arith.divf %260, %261 : vector<8x1xf32>
    %263 = vector.broadcast %255 : vector<8x1xf32> to vector<8x32xf32>
    %264 = arith.subf %247, %263 : vector<8x32xf32>
    %cst_98 = arith.constant 9.99999974E-6 : f32
    %265 = vector.broadcast %cst_98 : f32 to vector<8x1xf32>
    %266 = arith.addf %262, %265 : vector<8x1xf32>
    %267 = math.rsqrt %266 : vector<8x1xf32>
    %268 = vector.broadcast %267 : vector<8x1xf32> to vector<8x32xf32>
    %269 = arith.mulf %264, %268 : vector<8x32xf32>
    %270 = vector.broadcast %249 : vector<1x32xf32> to vector<8x32xf32>
    %271 = arith.mulf %269, %270 : vector<8x32xf32>
    %272 = vector.broadcast %251 : vector<1x32xf32> to vector<8x32xf32>
    %273 = arith.addf %271, %272 : vector<8x32xf32>
    %c0_99 = arith.constant 0 : index
    %c0_100 = arith.constant 0 : index
    %274 = vector.load %arg29[%c0_99, %c0_100] : memref<8x32xf32, #tpu.memory_space<vmem>>, vector<8x32xf32>
    tpu.vector_store %arg29[%c0_99, %c0_100], %273 {strides = array<i32>} : memref<8x32xf32, #tpu.memory_space<vmem>>, vector<8x32xf32>,
    %c1_i32 = arith.constant 1 : i32
    %275 = arith.cmpi eq, %arg1, %c1_i32 : i32
    %276 = arith.extui %275 : i1 to i32
    %c0_i32_101 = arith.constant 0 : i32
    %277 = arith.cmpi ne, %276, %c0_i32_101 : i32
    scf.if %277 {
      %c0_102 = arith.constant 0 : index
      %c0_103 = arith.constant 0 : index
      %c0_104 = arith.constant 0 : index
      %278 = vector.load %arg24[%c0_102, %c0_103, %c0_104] : memref<1x1x32xf32, #tpu.memory_space<vmem>>, vector<1x1x32xf32>
      %279 = vector.shape_cast %278 : vector<1x1x32xf32> to vector<1x32xf32>
      %c0_105 = arith.constant 0 : index
      %c0_106 = arith.constant 0 : index
      %c0_107 = arith.constant 0 : index
      %280 = vector.load %arg25[%c0_105, %c0_106, %c0_107] : memref<1x1x32xf32, #tpu.memory_space<vmem>>, vector<1x1x32xf32>
      %281 = vector.shape_cast %280 : vector<1x1x32xf32> to vector<1x32xf32>
      %cst_108 = arith.constant dense<0.000000e+00> : vector<8xf32>
      %282 = vector.multi_reduction <add>, %273, %cst_108 [1] : vector<8x32xf32> to vector<8xf32>
      %283 = vector.shape_cast %282 : vector<8xf32> to vector<8x1xf32>
      %cst_109 = arith.constant 3.200000e+01 : f32
      %284 = vector.broadcast %cst_109 : f32 to vector<8x1xf32>
      %285 = arith.divf %283, %284 : vector<8x1xf32>
      %286 = vector.broadcast %285 : vector<8x1xf32> to vector<8x32xf32>
      %287 = arith.subf %273, %286 : vector<8x32xf32>
      %288 = arith.mulf %287, %287 : vector<8x32xf32>
      %cst_110 = arith.constant dense<0.000000e+00> : vector<8xf32>
      %289 = vector.multi_reduction <add>, %288, %cst_110 [1] : vector<8x32xf32> to vector<8xf32>
      %290 = vector.shape_cast %289 : vector<8xf32> to vector<8x1xf32>
      %cst_111 = arith.constant 3.200000e+01 : f32
      %291 = vector.broadcast %cst_111 : f32 to vector<8x1xf32>
      %292 = arith.divf %290, %291 : vector<8x1xf32>
      %293 = vector.broadcast %285 : vector<8x1xf32> to vector<8x32xf32>
      %294 = arith.subf %273, %293 : vector<8x32xf32>
      %cst_112 = arith.constant 9.99999974E-6 : f32
      %295 = vector.broadcast %cst_112 : f32 to vector<8x1xf32>
      %296 = arith.addf %292, %295 : vector<8x1xf32>
      %297 = math.rsqrt %296 : vector<8x1xf32>
      %298 = vector.broadcast %297 : vector<8x1xf32> to vector<8x32xf32>
      %299 = arith.mulf %294, %298 : vector<8x32xf32>
      %300 = vector.broadcast %279 : vector<1x32xf32> to vector<8x32xf32>
      %301 = arith.mulf %299, %300 : vector<8x32xf32>
      %302 = vector.broadcast %281 : vector<1x32xf32> to vector<8x32xf32>
      %303 = arith.addf %301, %302 : vector<8x32xf32>
      %c0_113 = arith.constant 0 : index
      %c0_114 = arith.constant 0 : index
      %c0_115 = arith.constant 0 : index
      %304 = vector.load %arg26[%c0_113, %c0_114, %c0_115] : memref<1x8x32xf32, #tpu.memory_space<vmem>>, vector<1x8x32xf32>
      %305 = vector.shape_cast %304 : vector<1x8x32xf32> to vector<8x32xf32>
      %306 = vector.shape_cast %303 : vector<8x32xf32> to vector<1x8x32xf32>
      tpu.vector_store %arg26[%c0_113, %c0_114, %c0_115], %306 {strides = array<i32>} : memref<1x8x32xf32, #tpu.memory_space<vmem>>, vector<1x8x32xf32>,
    } else {
    }
    return
  }
  func.func @transform_0(%arg0: i32, %arg1: i32) -> (i32, i32, i32) {
    %c0_i32 = arith.constant 0 : i32
    %c0_i32_0 = arith.constant 0 : i32
    %c0_i32_1 = arith.constant 0 : i32
    return %arg0, %c0_i32, %c0_i32_0 : i32, i32, i32
  }
  func.func @transform_1(%arg0: i32, %arg1: i32) -> (i32, i32, i32) {
    %c0_i32 = arith.constant 0 : i32
    %c0_i32_0 = arith.constant 0 : i32
    %c0_i32_1 = arith.constant 0 : i32
    return %arg0, %c0_i32, %c0_i32_0 : i32, i32, i32
  }
  func.func @transform_2(%arg0: i32, %arg1: i32) -> (i32, i32, i32) {
    %c0_i32 = arith.constant 0 : i32
    %c0_i32_0 = arith.constant 0 : i32
    %c0_i32_1 = arith.constant 0 : i32
    %c0_i32_2 = arith.constant 0 : i32
    return %c0_i32, %c0_i32_0, %c0_i32_1 : i32, i32, i32
  }
  func.func @transform_3(%arg0: i32, %arg1: i32) -> (i32, i32, i32) {
    %c0_i32 = arith.constant 0 : i32
    %c0_i32_0 = arith.constant 0 : i32
    %c0_i32_1 = arith.constant 0 : i32
    %c0_i32_2 = arith.constant 0 : i32
    return %c0_i32, %c0_i32_0, %c0_i32_1 : i32, i32, i32
  }
  func.func @transform_4(%arg0: i32, %arg1: i32) -> (i32, i32, i32) {
    %c0_i32 = arith.constant 0 : i32
    %c0_i32_0 = arith.constant 0 : i32
    %c0_i32_1 = arith.constant 0 : i32
    %c0_i32_2 = arith.constant 0 : i32
    return %c0_i32, %c0_i32_0, %c0_i32_1 : i32, i32, i32
  }
  func.func @transform_5(%arg0: i32, %arg1: i32) -> (i32, i32, i32) {
    %c0_i32 = arith.constant 0 : i32
    %c0_i32_0 = arith.constant 0 : i32
    %c0_i32_1 = arith.constant 0 : i32
    %c0_i32_2 = arith.constant 0 : i32
    return %c0_i32, %c0_i32_0, %c0_i32_1 : i32, i32, i32
  }
  func.func @transform_6(%arg0: i32, %arg1: i32) -> (i32, i32, i32) {
    %c0_i32 = arith.constant 0 : i32
    %c0_i32_0 = arith.constant 0 : i32
    %c0_i32_1 = arith.constant 0 : i32
    %c0_i32_2 = arith.constant 0 : i32
    return %c0_i32, %c0_i32_0, %c0_i32_1 : i32, i32, i32
  }
  func.func @transform_7(%arg0: i32, %arg1: i32) -> (i32, i32, i32) {
    %c0_i32 = arith.constant 0 : i32
    %c0_i32_0 = arith.constant 0 : i32
    %c0_i32_1 = arith.constant 0 : i32
    %c0_i32_2 = arith.constant 0 : i32
    return %c0_i32, %c0_i32_0, %c0_i32_1 : i32, i32, i32
  }
  func.func @transform_8(%arg0: i32, %arg1: i32) -> (i32, i32, i32) {
    %c0_i32 = arith.constant 0 : i32
    %c0_i32_0 = arith.constant 0 : i32
    %c0_i32_1 = arith.constant 0 : i32
    %c0_i32_2 = arith.constant 0 : i32
    return %c0_i32, %c0_i32_0, %c0_i32_1 : i32, i32, i32
  }
  func.func @transform_9(%arg0: i32, %arg1: i32) -> (i32, i32, i32) {
    %c0_i32 = arith.constant 0 : i32
    %c0_i32_0 = arith.constant 0 : i32
    %c0_i32_1 = arith.constant 0 : i32
    %c0_i32_2 = arith.constant 0 : i32
    return %c0_i32, %c0_i32_0, %c0_i32_1 : i32, i32, i32
  }
  func.func @transform_10(%arg0: i32, %arg1: i32) -> (i32, i32, i32) {
    %c0_i32 = arith.constant 0 : i32
    %c0_i32_0 = arith.constant 0 : i32
    %c0_i32_1 = arith.constant 0 : i32
    %c0_i32_2 = arith.constant 0 : i32
    return %c0_i32, %c0_i32_0, %c0_i32_1 : i32, i32, i32
  }
  func.func @transform_11(%arg0: i32, %arg1: i32) -> (i32, i32, i32) {
    %c0_i32 = arith.constant 0 : i32
    %c0_i32_0 = arith.constant 0 : i32
    %c0_i32_1 = arith.constant 0 : i32
    %c0_i32_2 = arith.constant 0 : i32
    return %c0_i32, %c0_i32_0, %c0_i32_1 : i32, i32, i32
  }
  func.func @transform_12(%arg0: i32, %arg1: i32) -> (i32, i32, i32) {
    %c0_i32 = arith.constant 0 : i32
    %c0_i32_0 = arith.constant 0 : i32
    %c0_i32_1 = arith.constant 0 : i32
    %c0_i32_2 = arith.constant 0 : i32
    return %c0_i32, %c0_i32_0, %c0_i32_1 : i32, i32, i32
  }
  func.func @transform_13(%arg0: i32, %arg1: i32) -> (i32, i32, i32) {
    %c0_i32 = arith.constant 0 : i32
    %c0_i32_0 = arith.constant 0 : i32
    %c0_i32_1 = arith.constant 0 : i32
    %c0_i32_2 = arith.constant 0 : i32
    return %c0_i32, %c0_i32_0, %c0_i32_1 : i32, i32, i32
  }
  func.func @transform_14(%arg0: i32, %arg1: i32) -> (i32, i32, i32) {
    %c0_i32 = arith.constant 0 : i32
    %c0_i32_0 = arith.constant 0 : i32
    %c0_i32_1 = arith.constant 0 : i32
    %c0_i32_2 = arith.constant 0 : i32
    return %c0_i32, %c0_i32_0, %c0_i32_1 : i32, i32, i32
  }
  func.func @transform_15(%arg0: i32, %arg1: i32) -> (i32, i32, i32) {
    %c0_i32 = arith.constant 0 : i32
    %c0_i32_0 = arith.constant 0 : i32
    %c0_i32_1 = arith.constant 0 : i32
    %c0_i32_2 = arith.constant 0 : i32
    return %c0_i32, %c0_i32_0, %c0_i32_1 : i32, i32, i32
  }
  func.func @transform_16(%arg0: i32, %arg1: i32) -> (i32, i32, i32) {
    %c0_i32 = arith.constant 0 : i32
    %c0_i32_0 = arith.constant 0 : i32
    %c0_i32_1 = arith.constant 0 : i32
    %c0_i32_2 = arith.constant 0 : i32
    return %c0_i32, %c0_i32_0, %c0_i32_1 : i32, i32, i32
  }
  func.func @transform_17(%arg0: i32, %arg1: i32) -> (i32, i32, i32) {
    %c0_i32 = arith.constant 0 : i32
    %c0_i32_0 = arith.constant 0 : i32
    %c0_i32_1 = arith.constant 0 : i32
    %c0_i32_2 = arith.constant 0 : i32
    return %c0_i32, %c0_i32_0, %c0_i32_1 : i32, i32, i32
  }
  func.func @transform_18(%arg0: i32, %arg1: i32) -> (i32, i32, i32) {
    %c0_i32 = arith.constant 0 : i32
    %c0_i32_0 = arith.constant 0 : i32
    %c0_i32_1 = arith.constant 0 : i32
    %c0_i32_2 = arith.constant 0 : i32
    return %c0_i32, %c0_i32_0, %c0_i32_1 : i32, i32, i32
  }
  func.func @transform_19(%arg0: i32, %arg1: i32) -> (i32, i32, i32) {
    %c0_i32 = arith.constant 0 : i32
    %c0_i32_0 = arith.constant 0 : i32
    %c0_i32_1 = arith.constant 0 : i32
    %c0_i32_2 = arith.constant 0 : i32
    return %c0_i32, %c0_i32_0, %c0_i32_1 : i32, i32, i32
  }
  func.func @transform_20(%arg0: i32, %arg1: i32) -> (i32, i32, i32) {
    %c0_i32 = arith.constant 0 : i32
    %c0_i32_0 = arith.constant 0 : i32
    %c0_i32_1 = arith.constant 0 : i32
    %c0_i32_2 = arith.constant 0 : i32
    return %c0_i32, %c0_i32_0, %c0_i32_1 : i32, i32, i32
  }
  func.func @transform_21(%arg0: i32, %arg1: i32) -> (i32, i32, i32) {
    %c0_i32 = arith.constant 0 : i32
    %c0_i32_0 = arith.constant 0 : i32
    %c0_i32_1 = arith.constant 0 : i32
    %c0_i32_2 = arith.constant 0 : i32
    return %c0_i32, %c0_i32_0, %c0_i32_1 : i32, i32, i32
  }
  func.func @transform_22(%arg0: i32, %arg1: i32) -> (i32, i32, i32) {
    %c0_i32 = arith.constant 0 : i32
    %c0_i32_0 = arith.constant 0 : i32
    %c0_i32_1 = arith.constant 0 : i32
    %c0_i32_2 = arith.constant 0 : i32
    return %c0_i32, %c0_i32_0, %c0_i32_1 : i32, i32, i32
  }
  func.func @transform_23(%arg0: i32, %arg1: i32) -> (i32, i32, i32) {
    %c0_i32 = arith.constant 0 : i32
    %c0_i32_0 = arith.constant 0 : i32
    %c0_i32_1 = arith.constant 0 : i32
    %c0_i32_2 = arith.constant 0 : i32
    return %c0_i32, %c0_i32_0, %c0_i32_1 : i32, i32, i32
  }
  func.func @transform_24(%arg0: i32, %arg1: i32) -> (i32, i32, i32) {
    %c0_i32 = arith.constant 0 : i32
    %c0_i32_0 = arith.constant 0 : i32
    %c0_i32_1 = arith.constant 0 : i32
    return %arg0, %c0_i32, %c0_i32_0 : i32, i32, i32
  }
  func.func @transform_25(%arg0: i32, %arg1: i32) -> (i32, i32, i32, i32) {
    %c0_i32 = arith.constant 0 : i32
    %c0_i32_0 = arith.constant 0 : i32
    %c0_i32_1 = arith.constant 0 : i32
    return %arg1, %arg0, %c0_i32, %c0_i32_0 : i32, i32, i32, i32
  }
  func.func @transform_26(%arg0: i32, %arg1: i32) -> (i32, i32, i32, i32) {
    %c0_i32 = arith.constant 0 : i32
    %c0_i32_0 = arith.constant 0 : i32
    %c0_i32_1 = arith.constant 0 : i32
    return %arg1, %arg0, %c0_i32, %c0_i32_0 : i32, i32, i32, i32
  }
}

</mosaic_0001>

<bundles_post_ra>
// kernel: tpu_custom_call.1
= control target key start
LH: loop header
LB: loop body
LE: loop exit
PB: predicated region body
PF: predicated region fallthrough
CT: control target
= control target key end

     0   :  { %s3448_s0 = inlined_call_operand.vmem [shape: f32[2,8,32], index: 0, kind: input, shape index: {}]   ;;  %s3449_s1 = inlined_call_operand.vmem [shape: f32[2,8,32], index: 1, kind: input, shape index: {}]   ;;  %s3450_s2 = inlined_call_operand.vmem [shape: bf16[1,32,96], index: 2, kind: input, shape index: {}]   ;;  %s3451_s3 = inlined_call_operand.vmem [shape: f32[1,1,96], index: 3, kind: input, shape index: {}]   ;;  %s3452_s4 = inlined_call_operand.hbm [shape: bf16[1,32,32], index: 4, kind: input, shape index: {}]   ;;  %s3453_s5 = inlined_call_operand.vmem [shape: f32[1,1,32], index: 5, kind: input, shape index: {}]   ;;  %s3454_s6 = inlined_call_operand.hbm [shape: bf16[1,32,32], index: 6, kind: input, shape index: {}]   ;;  %s3455_s7 = inlined_call_operand.vmem [shape: f32[1,1,32], index: 7, kind: input, shape index: {}]   ;;  %s3456_s8 = inlined_call_operand.hbm [shape: bf16[1,32,64], index: 8, kind: input, shape index: {}]   ;;  %s3457_s9 = inlined_call_operand.vmem [shape: f32[1,1,64], index: 9, kind: input, shape index: {}]   ;;  %s3458_s10 = inlined_call_operand.hbm [shape: bf16[1,32,32], index: 10, kind: input, shape index: {}]   ;;  %s3459_s11 = inlined_call_operand.vmem [shape: f32[1,1,32], index: 11, kind: input, shape index: {}]   ;;  %s3460_s12 = inlined_call_operand.hbm [shape: bf16[1,32,64], index: 12, kind: input, shape index: {}]   ;;  %s3461_s13 = inlined_call_operand.vmem [shape: f32[1,1,64], index: 13, kind: input, shape index: {}]   ;;  %s3462_s14 = inlined_call_operand.vmem [shape: bf16[1,64,32], index: 14, kind: input, shape index: {}]   ;;  %s3463_s15 = inlined_call_operand.vmem [shape: f32[1,1,32], index: 15, kind: input, shape index: {}]   ;;  %s3464_s16 = inlined_call_operand.vmem [shape: f32[1,1,32], index: 16, kind: input, shape index: {}]   ;;  %s3465_s17 = inlined_call_operand.vmem [shape: f32[1,1,32], index: 17, kind: input, shape index: {}]   ;;  %s3466_s18 = inlined_call_operand.vmem [shape: f32[1,1,32], index: 18, kind: input, shape index: {}]   ;;  %s3467_s19 = inlined_call_operand.vmem [shape: f32[1,1,32], index: 19, kind: input, shape index: {}]   ;;  %s3468_s20 = inlined_call_operand.vmem [shape: f32[1,1,32], index: 20, kind: input, shape index: {}]   ;;  %s3469_s21 = inlined_call_operand.vmem [shape: f32[1,1,32], index: 21, kind: input, shape index: {}]   ;;  %s3470_s22 = inlined_call_operand.vmem [shape: f32[1,1,32], index: 22, kind: input, shape index: {}]   ;;  %s3471_s23 = inlined_call_operand.vmem [shape: f32[1,1,32], index: 23, kind: input, shape index: {}]   ;;  %s3472_s24 = inlined_call_operand.hbm [shape: f32[2,8,32], index: 24, kind: output, shape index: {0}]   ;;  %s3473_s25 = inlined_call_operand.vmem [shape: f32[2,2,32,8], index: 25, kind: output, shape index: {1}]   ;;  %s3474_s26 = inlined_call_operand.vmem [shape: f32[2,2,32,8], index: 26, kind: output, shape index: {2}]  }
   0x1   :  { %3489 = sst [smem:[#allocation29_spill]] %s3448_s0 }
   0x2   :  { %3490 = sst [smem:[#allocation30_spill]] %s3449_s1 }
   0x3   :  { %3491 = sst [smem:[#allocation31_spill]] %s3450_s2 }
   0x4   :  { %3492 = sst [smem:[#allocation32_spill]] %s3451_s3 }
   0x5   :  { %3493 = sst [smem:[#allocation33_spill]] %s3452_s4 }
   0x6   :  { %3494 = sst [smem:[#allocation34_spill]] %s3453_s5 }
   0x7   :  { %3495 = sst [smem:[#allocation35_spill]] %s3454_s6 }
   0x8   :  { %3496 = sst [smem:[#allocation36_spill]] %s3455_s7 }
   0x9   :  { %3497 = sst [smem:[#allocation37_spill]] %s3456_s8 }
   0xa   :  { %3498 = sst [smem:[#allocation38_spill]] %s3457_s9 }
   0xb   :  { %3499 = sst [smem:[#allocation39_spill]] %s3458_s10 }
   0xc   :  { %3500 = sst [smem:[#allocation40_spill]] %s3460_s12 }
   0xd   :  { %3501 = sst [smem:[#allocation41_spill]] %s3461_s13 }
   0xe   :  { %3502 = sst [smem:[#allocation42_spill]] %s3463_s15 }
   0xf   :  { %3503 = sst [smem:[#allocation43_spill]] %s3467_s19 }
  0x10   :  { %3504 = sst [smem:[#allocation44_spill]] %s3468_s20 }
  0x11   :  { %3505 = sst [smem:[#allocation45_spill]] %s3469_s21 }
  0x12   :  { %3506 = sst [smem:[#allocation46_spill]] %s3470_s22 }
  0x13   :  { %3507 = sst [smem:[#allocation47_spill]] %s3471_s23 }
  0x14   :  { %3508 = sst [smem:[#allocation48_spill]] %s3472_s24 }
  0x15   :  { %32 = vsyncpa [#allocation5], 0 }
  0x16   :  { %33 = vsyncpa [#allocation8], 0 }
  0x17   :  { %34 = vsyncpa [#allocation11], 0 }
  0x18   :  { %35 = vsyncpa [#allocation6], 0 }
  0x19   :  { %37 = vsyncpa [#allocation6 + $0x1], 0  ;;  %s3009_s27 = smov 0   ;;  %s3011_s3 = smov 0  }
  0x1a   :  { %s3013_s7 = smov 0   ;;  %s3015_s28 = smov 0  }
  0x1b   :  { %s3017_s8 = smov 0   ;;  %s3019_s4 = smov 0  }
  0x1c   :  { %s3021_s29 = smov 0   ;;  %s3023_s0 = smov 0  }
  0x1d LB: > { %3509 = sst [smem:[#allocation18_spill]] %s2828_s27  ;;  %s2277_s9 = sadd.s32 4294967295, %s2856_s0   ;;  %s2856_s0 = sphi %s3023_s0, %s43_s0   ;;  %s2852_s29 = sphi %s3021_s29, %s3557_s29   ;;  %s2848_s4 = sphi %s3019_s4, %s3556_s4   ;;  %s2844_s8 = sphi %s3017_s8, %s3555_s8   ;;  %s2840_s28 = sphi %s3015_s28, %s3554_s28   ;;  %s2836_s7 = sphi %s3013_s7, %s3553_s7   ;;  %s2832_s3 = sphi %s3011_s3, %s3552_s3   ;;  %s2828_s27 = sphi %s3009_s27, %s3551_s27  }
  0x1e   : > { %3510 = sst [smem:[#allocation19_spill]] %s2832_s3  ;;  %s2278_s30 = sadd.s32 4294967294, %s2856_s0  }
  0x1f   : > { %3511 = sst [smem:[#allocation20_spill]] %s2836_s7  ;;  %s52_s2 = sadd.s32 1, %s2848_s4 }
  0x20   : > { %3512 = sst [smem:[#allocation21_spill]] %s2848_s4  ;;  %s55_s5 = sadd.s32 1, %s2852_s29 }
  0x21   : > { %3513 = sst [smem:[#allocation22_spill]] %s2852_s29  ;;  %p53_p0 = scmp.ge.s32.totalorder %s52_s2, 2 }
  0x22   : > { %3514 = sst [smem:[#allocation23_spill]] %s2856_s0  ;;  %s576_s10 = sadd.s32 1, %s2836_s7 }
  0x23   : > { %p586_p1 = scmp.ne.s32.totalorder %s2836_s7, %s2832_s3  ;;  %p587_p2 = scmp.eq.s32.totalorder %s2277_s9, 3 }
  0x24   : > { %s3559_s2 = smov (%p53_p0, %s52_s2), 0  ;;  %s3561_s5 = smov (!%p53_p0, %s55_s5), %s2852_s29 }
  0x25   : > { %3515 = sst [smem:[#allocation24_spill]] %s3559_s2  ;;  %p3059_p3 = por %p587_p2, %p586_p1 }
  0x26   : > { %p592_p4 = scmp.ne.s32.totalorder %s2832_s3, %s2828_s27  ;;  %p57_p5 = scmp.ge.s32.totalorder %s3561_s5, 2 }
  0x27   : > { %s3516_s6 = scalar_select %p3059_p3, 1, 0 }
  0x28   : > { %p593_p6 = scmp.eq.s32.totalorder %s2278_s30, 3  ;;  %p2279_p7 = scmp.ge.s32.totalorder %s2856_s0, 1 }
  0x29   : > { %3517 = sst [smem:[#allocation25_spill]] %s3516_s6  ;;  %p656_p8 = scmp.lt.s32.totalorder %s2856_s0, 5 }
  0x2a   : > { %s3563_s5 = smov (%p57_p5, %s3561_s5), 0  ;;  %p3069_p9 = por %p593_p6, %p592_p4 }
  0x2b   : > { %3518 = sst [smem:[#allocation26_spill]] %s3563_s5  ;;  %p3073_p10 = pnand %p2279_p7, %p656_p8 }
  0x2c   : > { %s3519_s1 = scalar_select %p3069_p9, 1, 0 }
  0x2d   : > { %s573_s2 = ssub.s32 %s2852_s29, %s3563_s5  ;;  %p2432_p12 = pneg %p3073_p10 }
  0x2e   : > { %3520 = sst [smem:[#allocation27_spill]] %s3519_s1  ;;  %p574_p11 = scmp.eq.s32.totalorder %s573_s2, 0 }
  0x2f   : > { %p3081_p13 = scmp.eq.s32.totalorder %s2277_s9, 0  ;;  %s3525_s6 = sld [smem:[#allocation35_spill]] }
  0x30   : > { %s3086_s27 = scalar_select %p574_p11, %s2836_s7, %s576_s10  }
  0x31   : > { %p3090_p0 = pnand %p3081_p13, %p2432_p12  ;;  %s2858_s5 = smov [#allocation7]  }
  0x32   : > { %3523 = sst [smem:[#allocation28_spill]] %s3086_s27  ;;  %s692_s9 = sshll.u32 %s2858_s5, 4  ;;  %s693_s9 = int_to_ptr.vmem [resolvable:$true] %s692_s9 }
  0x33   : > { %s3526_s22 = sld [smem:[#allocation39_spill]]  ;;  %s2859_s10 = smov 64  }
  0x34   : > { %s2860_s27 = smov 4   ;;  %s2861_s7 = smov [#allocation10]  }
  0x35   : > { %s690_s2 = sshll.u32 %s3525_s6, 4  ;;  %s726_s20 = sshll.u32 %s2861_s7, 4  ;;  %s691_s2 = int_to_ptr.hbm [resolvable:$true] %s690_s2  ;;  %s727_s20 = int_to_ptr.vmem [resolvable:$true] %s726_s20 }
  0x36   : > { %2438 = dma.hbm_to_vmem [thread:$0]  (!%p3090_p0), %s691_s2, 256, %s693_s9, [#allocation8], %s2859_s10, %s2859_s10, %s2860_s27  }
  0x37   : > { %s3527_s5 = sld [smem:[#allocation33_spill]]  ;;  %s2864_s24 = smov [#allocation12]  }
  0x38   : > { %s3528_s13 = sld [smem:[#allocation37_spill]]  ;;  %s743_s6 = sshll.u32 %s2864_s24, 4  ;;  %s744_s6 = int_to_ptr.vmem [resolvable:$true] %s743_s6 }
  0x39   : > { %s724_s21 = sshll.u32 %s3526_s22, 4  ;;  %s2862_s22 = smov [#allocation4]   ;;  %s725_s21 = int_to_ptr.hbm [resolvable:$true] %s724_s21 }
  0x3a   : > { %2444 = dma.hbm_to_vmem [thread:$0]  (!%p3090_p0), %s725_s21, 256, %s727_s20, [#allocation11], %s2859_s10, %s2859_s10, %s2860_s27  }
  0x3b   : > { %s675_s23 = sshll.u32 %s2862_s22, 4  ;;  %s3529_s12 = sld [smem:[#allocation40_spill]]  ;;  %s676_s23 = int_to_ptr.vmem [resolvable:$true] %s675_s23 }
  0x3c   : > { %s2863_s21 = smov [#allocation9]  }
  0x3d   : > { %s673_s1 = sshll.u32 %s3527_s5, 4  ;;  %s709_s9 = sshll.u32 %s2863_s21, 4  ;;  %s674_s1 = int_to_ptr.hbm [resolvable:$true] %s673_s1  ;;  %s710_s9 = int_to_ptr.vmem [resolvable:$true] %s709_s9 }
  0x3e   : > { %s707_s19 = sshll.u32 %s3528_s13, 4  ;;  %806 = sbr.rel (%p3073_p10) target bundleno = 3781 (0xec5), region = 116  ;;  %s708_s19 = int_to_ptr.hbm [resolvable:$true] %s707_s19 }
  0x3f   : > { %2435 = dma.hbm_to_vmem [thread:$0]  (!%p3090_p0), %s674_s1, 256, %s676_s23, [#allocation5], %s2859_s10, %s2859_s10, %s2860_s27  }
  0x40   : > { %2441 = dma.hbm_to_vmem [thread:$0]  (!%p3090_p0), %s708_s19, 256, %s710_s9, [#allocation8], %s2859_s10, %s2859_s10, %s2860_s27  }
  0x41   : > { %s741_s20 = sshll.u32 %s3529_s12, 4  ;;  %s742_s20 = int_to_ptr.hbm [resolvable:$true] %s741_s20 }
  0x42   : > { %2447 = dma.hbm_to_vmem [thread:$0]  (!%p3090_p0), %s742_s20, 256, %s744_s6, [#allocation11], %s2859_s10, %s2859_s10, %s2860_s27  }
  0x43   : > { %2811 = dma.done.wait (%p3081_p13), [#allocation5], 256  }
  0x44   : > { %2813 = vsyncadd (%p3081_p13), [#allocation5], 4294967040 }
  0x45   : > { %2815 = dma.done.wait (%p3081_p13), [#allocation8], 512  }
  0x46   : > { %2817 = vsyncadd (%p3081_p13), [#allocation8], 4294966784 }
  0x47   : > { %2819 = dma.done.wait (%p3081_p13), [#allocation11], 512  }
  0x48   : > { %2821 = vsyncadd (%p3081_p13), [#allocation11], 4294966784  ;;  %s3487_s13 = sand.u32 1, %s2832_s3   ;;  %p918_p1 = scmp.lt.s32.totalorder %s2844_s8, 1 }
  0x49   : > { %s3137_s15 = sshll.u32 %s3487_s13, 3  ;;  %p926_p2 = scmp.lt.s32.totalorder %s2840_s28, 1 }
  0x4a   : > { %s919_s19 = scalar_select %p918_p1, %s2844_s8, 1 }
  0x4b   : > { %s927_s27 = scalar_select %p926_p2, %s2840_s28, 1 }
  0x4c   : > { %s2293_s4 = sshll.u32 %s919_s19, 3  ;;  %s2295_s0 = sshll.u32 %s919_s19, 2 }
  0x4d   : > { %s3530_s5 = sld [smem:[#allocation29_spill]]  ;;  %s2296_s2 = sshll.u32 %s927_s27, 3 }
  0x4e   : > { %s3531_s29 = sld [smem:[#allocation30_spill]]  ;;  %s932_s20 = sadd.s32 %s2296_s2, %s2295_s0 }
  0x4f   : > { %s2297_s21 = sshll.u32 %s932_s20, 3  ;;  %s895_s3 = scalar_lea.vmem [#allocation13], %s3137_s15 }
  0x50   : > { %s3151_s6 = scalar_lea.vmem %s3473_s25, %s2297_s21  ;;  %s3156_s19 = scalar_lea.vmem %s3474_s26, %s2297_s21 }
  0x51   : > { %p2301_p4 = scmp.ne.s32.totalorder %s2840_s28, 0 }
  0x52   : > { %s3532_s0 = sld [smem:[#allocation38_spill]] (!%p2301_p4) }
  0x53   : > { %s921_s1 = scalar_lea.vmem %s3530_s5, %s2293_s4  ;;  %948 = sbr.rel (%p2301_p4) target bundleno = 230 (0xe6), region = 140 }
  0x54   : > { %s925_s7 = scalar_lea.vmem %s3531_s29, %s2293_s4 }
  0x58   : > { %v2395_v0 = vld [vmem:[#allocation9 + $0x8] sm:$0xff]  ;;  %v949_v1 = vld [vmem:[%s921_s1] sm:$0xff]  ;;  %vm950_vm0 = vcmask 261120   ;;  %v2394_v2 = vld [vmem:[#allocation9] sm:$0xff]  ;;  %vm990_vm1 = vcmask 523264  }
  0x59   : > { %951 = vst.msk [vmem:[#allocation2] sm:$0xff] %vm950_vm0, %v949_v1  ;;  %983 = vmatpush.bf16.msra.mxu0 %v2395_v0  ;;  %v952_v3 = vld [vmem:[%s925_s7] sm:$0xff] }
  0x5a   : > { %v953_v4 = vpack.c.bf16 %v952_v3, %v952_v3  ;;  %v2543_v5 = vld [vmem:[%s3532_s0] ss:$0 sm:$0xff] }
  0x5d   : > { %984 = vmatpush.bf16.msra.mxu0 %v2394_v2 }
  0x60   : > { %2310 = vmatmul.msk.bf16.vlgmr.msra.gmra.mxu0 %vm950_vm0, %v953_v4 }
  0xdd   : > { %v986_v6 = vpop.f32.mrf.mxu0 }
  0xde   : > { %v987_v7 = vadd.f32 %v2543_v5, %v986_v6 }
  0xe0   : > { %991 = vst.msk [vmem:[#allocation3] sm:$0xff] %vm990_vm1, %v987_v7 }
  0xe5   : > { %v988_v8 = vpop.f32.mrf.mxu0 }
  0xe6 PF: > { %s3533_s10 = sld [smem:[#allocation31_spill]]  ;;  %v3169_v11 = vld [vmem:[#allocation2] sm:$0xff]  ;;  %vm1014_vm2 = vcmask 261120   ;;  %s2865_s29 = smov 104   ;;  %vm1050_vm3 = vcmask 64512   ;;  %vm1255_vm4 = vcmask 1043456  }
  0xe7   : > { %v993_v12 = vpack.c.bf16 %v3169_v11, %v3169_v11  ;;  %s3534_s23 = sld [smem:[#allocation32_spill]]  ;;  %s2866_s7 = smov 120  }
  0xe8   : > { %s2867_s2 = smov 112   ;;  %s2868_s20 = smov 96  }
  0xe9   : > { %s2869_s21 = smov 64   ;;  %s2870_s9 = smov 16  }
  0xea   : > { %s2871_s24 = smov 8   ;;  %s2872_s27 = smov 24  }
  0xeb   : > { %s3535_s0 = sld [smem:[#allocation34_spill]]  ;;  %p2389_p5 = scmp.ne.s32.totalorder %s2840_s28, 1 }
  0xec   : > { %v2397_v9 = vld [vmem:[%s3533_s10 + $0x8] sm:$0xff]  ;;  %v2396_v10 = vld [vmem:[%s3533_s10] sm:$0xff]  ;;  %s3537_s4 = sld [smem:[#allocation43_spill]] }
  0xed   : > { %1024 = vmatpush.bf16.msra.mxu0 %v2397_v9  ;;  %v2544_v13 = vld [vmem:[%s3534_s23] ss:$0 sm:$0xff]  ;;  %s3536_s23 = sld [smem:[#allocation36_spill]] }
  0xee   : > { %s3538_s22 = sld [smem:[#allocation41_spill]] }
  0xef   : > { %s3543_s12 = sld [smem:[#allocation47_spill]] (!%p2389_p5) }
  0xf1   : > { %1025 = vmatpush.bf16.msra.mxu0 %v2396_v10 }
  0xf4   : > { %2319 = vmatmul.msk.bf16.vlgmr.msra.gmra.mxu0 %vm1014_vm2, %v993_v12 }
 0x171   : > { %v1027_v14 = vpop.f32.mrf.mxu0 }
 0x172   : > { %v1028_v15 = vadd.f32 %v2544_v13, %v1027_v14 }
 0x174   : > { %1038 = vrot.lane.b32.xlu1 %v1028_v15, %s2865_s29  ;;  %1032 = vrot.lane.b32.xlu0 %v1028_v15, %s2866_s7  ;;  %v1041_v17 = vpack.c.bf16 %v1028_v15, %v1028_v15 }
 0x176   : > { %v1046_v18 = vunpack.c.l.b16 %v1041_v17 }
 0x178   : > { %v3180_v19 = vpack.c.b16 %v1046_v18, %v1046_v18 }
 0x179   : > { %v1029_v16 = vpop.f32.mrf.mxu0 }
 0x17c   : > { %1035 = vrot.lane.b32.xlu0 %v1028_v15, %s2867_s2 }
 0x184   : > { %1048 = vrot.lane.b32.xlu0 %v3180_v19, %s2868_s20 }
 0x1e6   : > { %v1033_v20 = vpop.permute.xlu0 %1032  ;;  %v1039_v26 = vpop.permute.xlu1 %1038 }
 0x1e7   : > { %v1042_v21 = vpack.c.bf16 %v1033_v20, %v1033_v20  ;;  %v1044_v28 = vpack.c.bf16 %v1039_v26, %v1039_v26 }
 0x1e9   : > { %v1071_v22 = vunpack.c.l.b16 %v1042_v21  ;;  %v1119_v31 = vunpack.c.l.b16 %v1044_v28 }
 0x1eb   : > { %v3184_v23 = vpack.c.b16 %v1071_v22, %v1071_v22  ;;  %v1120_v33 = vpack.c.b16 %v1119_v31, %v1119_v31 }
 0x1ed   : > { %1073 = vrot.lane.b32.xlu1 %v3184_v23, %s2868_s20 }
 0x1ee   : > { %v1036_v24 = vpop.permute.xlu0 %1035 }
 0x1ef   : > { %v1043_v25 = vpack.c.bf16 %v1036_v24, %v1036_v24 }
 0x1f1   : > { %v1095_v27 = vunpack.c.l.b16 %v1043_v25 }
 0x1f3   : > { %v1096_v29 = vpack.c.b16 %v1095_v27, %v1095_v27 }
 0x1f5   : > { %1097 = vrot.lane.b32.xlu2 %v1096_v29, %s2868_s20 }
 0x1f6   : > { %v1049_v30 = vpop.permute.xlu0 %1048 }
 0x1f7   : > { %v1055_v32 = vsel %vm1050_vm3, %v1049_v30, 0 }
 0x1f8   : > { %1064 = vmatpush.bf16.xpose.msra.mxu1 %v1055_v32 }
 0x1fd   : > { %1121 = vrot.lane.b32.xlu2 %v1120_v33, %s2868_s20 }
 0x1ff   : > { %2320 = vmatmul.msk.bf16.vlgmr.msra.gmra.mxu1 %vm1050_vm3, %v1041_v17 }
 0x24f   : > { %v1098_v34 = vpop.permute.xlu2 %1097 }
 0x250   : > { %v1103_v35 = vsel %vm1050_vm3, %v1098_v34, 0 }
 0x251   : > { %1112 = vmatpush.bf16.xpose.msra.mxu3 %v1103_v35 }
 0x257   : > { %v1122_v36 = vpop.permute.xlu2 %1121 }
 0x258   : > { %2322 = vmatmul.msk.bf16.vlgmr.msra.gmra.mxu3 %vm1050_vm3, %v1043_v25  ;;  %v1127_v37 = vsel %vm1050_vm3, %v1122_v36, 0 }
 0x259   : > { %1136 = vmatpush.bf16.xpose.msrb.mxu0 %v1127_v37 }
 0x25f   : > { %v1074_v38 = vpop.permute.xlu1 %1073 }
 0x260   : > { %2323 = vmatmul.msk.bf16.vlgmr.msrb.gmra.mxu0 %vm1050_vm3, %v1044_v28  ;;  %v1079_v39 = vsel %vm1050_vm3, %v1074_v38, 0 }
 0x261   : > { %1088 = vmatpush.bf16.xpose.msra.mxu2 %v1079_v39 }
 0x268   : > { %2321 = vmatmul.msk.bf16.vlgmr.msra.gmra.mxu2 %vm1050_vm3, %v1042_v21 }
 0x27c   : > { %v1066_v40 = vpop.f32.mrf.mxu1 }
 0x27d   : > { %v1142_v47 = vsel %vm1050_vm3, %v1066_v40, -inf }
 0x284   : > { %v1068_v41 = vpop.f32.mrf.mxu1 }
 0x2db   : > { %v1114_v42 = vpop.f32.mrf.mxu3 }
 0x2dc   : > { %v1148_v43 = vsel %vm1050_vm3, %v1114_v42, -inf }
 0x2dd   : > { %1149 = vmax.xlane.f32.xlu2 %v1148_v43  ;;  %v1138_v44 = vpop.f32.mrf.mxu0 }
 0x2de   : > { %v1151_v45 = vsel %vm1050_vm3, %v1138_v44, -inf }
 0x2df   : > { %1152 = vmax.xlane.f32.xlu0 %v1151_v45 }
 0x2e3   : > { %v1116_v46 = vpop.f32.mrf.mxu3 }
 0x2e5   : > { %v1140_v48 = vpop.f32.mrf.mxu0  ;;  %1143 = vmax.xlane.f32.xlu2 %v1142_v47 }
 0x2eb   : > { %v1090_v49 = vpop.f32.mrf.mxu2 }
 0x2ec   : > { %v1145_v50 = vsel %vm1050_vm3, %v1090_v49, -inf }
 0x2ed   : > { %1146 = vmax.xlane.f32.xlu1 %v1145_v50 }
 0x2f3   : > { %v1092_v51 = vpop.f32.mrf.mxu2 }
 0x350   : > { %v1150_v52 = vpop.xlane.xlu2 %1149 }
 0x351   : > { %v1156_v53 = vsub.f32 %v1114_v42, %v1150_v52 }
 0x352   : > { %v1153_v54 = vpop.xlane.xlu0 %1152 }
 0x353   : > { %v1162_v55 = vmul.f32 1.442695, %v1156_v53  ;;  %v1157_v56 = vsub.f32 %v1138_v44, %v1153_v54 }
 0x355   : > { %2556 = vpow2.f32 %v1162_v55  ;;  %v1164_v57 = vmul.f32 1.442695, %v1157_v56 }
 0x357   : > { %2558 = vpow2.f32 %v1164_v57 }
 0x358   : > { %v1144_v3 = vpop.xlane.xlu2 %1143 }
 0x359   : > { %v1154_v4 = vsub.f32 %v1066_v40, %v1144_v3 }
 0x35b   : > { %v3202_v58 = vpop.eup %2556  ;;  %v1158_v5 = vmul.f32 1.442695, %v1154_v4 }
 0x35c   : > { %v1172_v59 = vsel %vm1050_vm3, %v3202_v58, 0.0 }
 0x35d   : > { %v2559_v60 = vpop.eup %2558  ;;  %1173 = vadd.xlane.f32.xlu2 %v1172_v59 }
 0x35e   : > { %v1175_v61 = vsel %vm1050_vm3, %v2559_v60, 0.0 }
 0x35f   : > { %1176 = vadd.xlane.f32.xlu0 %v1175_v61 }
 0x360   : > { %v1147_v62 = vpop.xlane.xlu1 %1146 }
 0x361   : > { %v1155_v63 = vsub.f32 %v1090_v49, %v1147_v62 }
 0x363   : > { %v1160_v0 = vmul.f32 1.442695, %v1155_v63 }
 0x365   : > { %2560 = vpow2.f32 %v1160_v0 }
 0x366   : > { %2562 = vpow2.f32 %v1158_v5 }
 0x36b   : > { %v3207_v1 = vpop.eup %2560 }
 0x36c   : > { %v1169_v2 = vsel %vm1050_vm3, %v3207_v1, 0.0  ;;  %v3213_v6 = vpop.eup %2562 }
 0x36d   : > { %1170 = vadd.xlane.f32.xlu1 %v1169_v2  ;;  %v1166_v7 = vsel %vm1050_vm3, %v3213_v6, 0.0 }
 0x373   : > { %1314 = vrot.lane.b32.xlu0 %v1120_v33, %s2869_s21 }
 0x375   : > { %1293 = vrot.lane.b32.xlu2 %v1096_v29, %s2869_s21 }
 0x37b   : > { %1250 = vrot.lane.b32.xlu0 %v3180_v19, %s2869_s21 }
 0x386   : > { %1272 = vrot.lane.b32.xlu1 %v3184_v23, %s2869_s21 }
 0x3b0   : > { %1167 = vadd.xlane.f32.xlu1 %v1166_v7 }
 0x3d0   : > { %v1174_v8 = vpop.xlane.xlu2 %1173 }
 0x3d1   : > { %2564 = vrcp.f32 %v1174_v8  ;;  %v1219_v19 = vand.u32 2147483648, %v1174_v8  ;;  %vm1213_vm6 = vweird.f32 %v1174_v8  ;;  %v1217_v21 = vand.u32 2147483647, %v1174_v8 }
 0x3d2   : > { %v1177_v9 = vpop.xlane.xlu0 %1176 }
 0x3d3   : > { %2566 = vrcp.f32 %v1177_v9  ;;  %v1234_v22 = vand.u32 2147483648, %v1177_v9  ;;  %v1232_v25 = vand.u32 2147483647, %v1177_v9  ;;  %v1220_v27 = vor.u32 1.1754944e-38, %v1219_v19 }
 0x3d4   : > { %vm1228_vm9 = vweird.f32 %v1177_v9  ;;  %vm1218_vm10 = vcmp.eq.f32.partialorder %v1217_v21, 8.507059e+37 }
 0x3d5   : > { %v1235_v30 = vor.u32 1.1754944e-38, %v1234_v22  ;;  %vm1233_vm12 = vcmp.eq.f32.partialorder %v1232_v25, 8.507059e+37 }
 0x3d7   : > { %v2565_v10 = vpop.eup %2564 }
 0x3d8   : > { %v1209_v12 = vmul.f32 %v2565_v10, %v1174_v8  ;;  %v1294_v13 = vpop.permute.xlu2 %1293  ;;  %vm1214_vm5 = vweird.f32 %v2565_v10 }
 0x3d9   : > { %v2567_v14 = vpop.eup %2566  ;;  %v1299_v15 = vsel %vm1255_vm4, %v1294_v13, 0  ;;  %vm1215_vm8 = vmor %vm1213_vm6, %vm1214_vm5 }
 0x3da   : > { %v1210_v16 = vsub.f32 1.0, %v1209_v12  ;;  %v1224_v17 = vmul.f32 %v2567_v14, %v1177_v9  ;;  %1308 = vmatpush.bf16.msrb.mxu3 %v1299_v15  ;;  %vm1229_vm7 = vweird.f32 %v2567_v14  ;;  %v2398_v15 = vld [vmem:[#allocation4] sm:$0xff] }
 0x3db   : > { %vm1230_vm11 = vmor %vm1228_vm9, %vm1229_vm7  ;;  %vm1350_vm9 = vcmask 195584  }
 0x3dc   : > { %v1211_v18 = vmul.f32 %v2565_v10, %v1210_v16  ;;  %v1225_v20 = vsub.f32 1.0, %v1224_v17 }
 0x3de   : > { %v1212_v23 = vadd.f32 %v2565_v10, %v1211_v18  ;;  %v1226_v24 = vmul.f32 %v2567_v14, %v1225_v20 }
 0x3e0   : > { %v1216_v26 = vsel %vm1215_vm8, %v2565_v10, %v1212_v23  ;;  %v1227_v28 = vadd.f32 %v2567_v14, %v1226_v24  ;;  %v1171_v29 = vpop.xlane.xlu1 %1170  ;;  %vm1348_vm8 = vcmask 130048   ;;  %v2545_v23 = vld [vmem:[%s3535_s0] ss:$0 sm:$0xff] }
 0x3e1   : > { %2568 = vrcp.f32 %v1171_v29  ;;  %v1221_v32 = vsel %vm1218_vm10, %v1220_v27, %v1216_v26  ;;  %v1204_v43 = vand.u32 2147483648, %v1171_v29  ;;  %v1202_v45 = vand.u32 2147483647, %v1171_v29 }
 0x3e2   : > { %v1231_v31 = vsel %vm1230_vm11, %v2567_v14, %v1227_v28  ;;  %v1240_v34 = vmul.f32 %v3202_v58, %v1221_v32  ;;  %vm1198_vm14 = vweird.f32 %v1171_v29  ;;  %v2399_v14 = vld [vmem:[#allocation4 + $0x8] sm:$0xff] }
 0x3e3   : > { %v1236_v33 = vsel %vm1233_vm12, %v1235_v30, %v1231_v31  ;;  %v1205_v49 = vor.u32 1.1754944e-38, %v1204_v43  ;;  %vm1203_vm0 = vcmp.eq.f32.partialorder %v1202_v45, 8.507059e+37 }
 0x3e4   : > { %v1241_v35 = vmul.f32 %v2559_v60, %v1236_v33  ;;  %1244 = vst.msk [vmem:[%s3151_s6 + $0x10] sm:$0xff] %vm1050_vm3, %v1240_v34  ;;  %v1248_v37 = vpack.c.bf16 %v1240_v34, %v1240_v34 }
 0x3e5   : > { %v1315_v36 = vpop.permute.xlu0 %1314 }
 0x3e6   : > { %1245 = vst.msk [vmem:[%s3151_s6 + $0x18] sm:$0xff] %vm1050_vm3, %v1241_v35  ;;  %v1320_v38 = vsel %vm1255_vm4, %v1315_v36, 0  ;;  %2326 = vmatmul.msk.bf16.vlgmr.msrb.gmra.mxu3 %vm1050_vm3, %v1248_v37  ;;  %v1249_v41 = vpack.c.bf16 %v1241_v35, %v1241_v35 }
 0x3e7   : > { %v2569_v39 = vpop.eup %2568  ;;  %1329 = vmatpush.bf16.msra.mxu0 %v1320_v38 }
 0x3e8   : > { %v1194_v40 = vmul.f32 %v2569_v39, %v1171_v29  ;;  %vm1199_vm13 = vweird.f32 %v2569_v39  ;;  %v2873_v29 = vmov 32.0  }
 0x3e9   : > { %vm1200_vm15 = vmor %vm1198_vm14, %vm1199_vm13 }
 0x3ea   : > { %v1195_v42 = vsub.f32 1.0, %v1194_v40  ;;  %2327 = vmatmul.msk.bf16.vlgmr.msra.gmra.mxu0 %vm1050_vm3, %v1249_v41  ;;  %v2401_v40 = vld [vmem:[#allocation7 + $0x8] sm:$0xff]  ;;  %v2400_v41 = vld [vmem:[#allocation7] sm:$0xff] }
 0x3ec   : > { %v1196_v44 = vmul.f32 %v2569_v39, %v1195_v42  ;;  %v1466_v42 = vld [vmem:[#allocation3] sm:$0xff] }
 0x3ed   : > { %v1251_v46 = vpop.permute.xlu0 %1250  ;;  %1488 = vrot.lane.b32.xlu1 %v1466_v42, %s2865_s29 }
 0x3ee   : > { %v1197_v47 = vadd.f32 %v2569_v39, %v1196_v44  ;;  %v1257_v48 = vsel %vm1255_vm4, %v1251_v46, 0  ;;  %v3253_v44 = vpack.c.bf16 %v1466_v42, %v1466_v42 }
 0x3ef   : > { %1266 = vmatpush.bf16.msrb.mxu1 %v1257_v48 }
 0x3f0   : > { %v1201_v50 = vsel %vm1200_vm15, %v2569_v39, %v1197_v47  ;;  %v1499_v46 = vsel %vm1050_vm3, %v3253_v44, 0 }
 0x3f1   : > { %v1206_v51 = vsel %vm1203_vm0, %v1205_v49, %v1201_v50  ;;  %1508 = vmatpush.bf16.xpose.msra.mxu3 %v1499_v46 }
 0x3f2   : > { %v1239_v52 = vmul.f32 %v3207_v1, %v1206_v51 }
 0x3f3   : > { %1382 = vmatpush.bf16.msra.mxu1 %v2399_v14 }
 0x3f4   : > { %1243 = vst.msk [vmem:[%s3151_s6 + $0x8] sm:$0xff] %vm1050_vm3, %v1239_v52  ;;  %v1247_v55 = vpack.c.bf16 %v1239_v52, %v1239_v52 }
 0x3f5   : > { %1485 = vrot.lane.b32.xlu1 %v1466_v42, %s2867_s2 }
 0x3f7   : > { %1383 = vmatpush.bf16.msra.mxu1 %v2398_v15 }
 0x3f8   : > { %v1273_v53 = vpop.permute.xlu1 %1272 }
 0x3f9   : > { %v1278_v54 = vsel %vm1255_vm4, %v1273_v53, 0 }
 0x3fa   : > { %1287 = vmatpush.bf16.msrb.mxu2 %v1278_v54  ;;  %v2546_v54 = vld [vmem:[%s3464_s16] ss:$0 sm:$0xff] }
 0x3fd   : > { %2325 = vmatmul.msk.bf16.vlgmr.msrb.gmra.mxu2 %vm1050_vm3, %v1247_v55 }
 0x3fe   : > { %1459 = vmatpush.bf16.msra.mxu2 %v2401_v40 }
 0x402   : > { %1460 = vmatpush.bf16.msra.mxu2 %v2400_v41 }
 0x423   : > { %v1168_v56 = vpop.xlane.xlu1 %1167 }
 0x424   : > { %2570 = vrcp.f32 %v1168_v56  ;;  %v1189_v60 = vand.u32 2147483648, %v1168_v56  ;;  %v1187_v62 = vand.u32 2147483647, %v1168_v56  ;;  %vm1183_vm5 = vweird.f32 %v1168_v56 }
 0x425   : > { %2572 = vrcp.f32 %v2873_v29 }
 0x426   : > { %v1190_v0 = vor.u32 1.1754944e-38, %v1189_v60  ;;  %vm1188_vm7 = vcmp.eq.f32.partialorder %v1187_v62, 8.507059e+37 }
 0x42a   : > { %v2571_v57 = vpop.eup %2570 }
 0x42b   : > { %v1179_v58 = vmul.f32 %v2571_v57, %v1168_v56  ;;  %vm1184_vm1 = vweird.f32 %v2571_v57  ;;  %v2573_v30 = vpop.eup %2572  ;;  %v2547_v56 = vld [vmem:[%s3465_s17] ss:$0 sm:$0xff] }
 0x42c   : > { %vm1185_vm6 = vmor %vm1183_vm5, %vm1184_vm1  ;;  %v1396_v31 = vmul.f32 32.0, %v2573_v30  ;;  %vm1400_vm10 = vweird.f32 %v2573_v30 }
 0x42d   : > { %v1180_v59 = vsub.f32 1.0, %v1179_v58 }
 0x42e   : > { %v1397_v32 = vsub.f32 1.0, %v1396_v31 }
 0x42f   : > { %v1181_v61 = vmul.f32 %v2571_v57, %v1180_v59 }
 0x430   : > { %v1398_v33 = vmul.f32 %v2573_v30, %v1397_v32 }
 0x431   : > { %v1182_v63 = vadd.f32 %v2571_v57, %v1181_v61 }
 0x432   : > { %v1399_v34 = vadd.f32 %v2573_v30, %v1398_v33 }
 0x433   : > { %v1186_v1 = vsel %vm1185_vm6, %v2571_v57, %v1182_v63 }
 0x434   : > { %v1191_v2 = vsel %vm1188_vm7, %v1190_v0, %v1186_v1  ;;  %v3248_v35 = vsel %vm1400_vm10, %v2573_v30, %v1399_v34 }
 0x435   : > { %v1238_v3 = vmul.f32 %v3213_v6, %v1191_v2 }
 0x437   : > { %1242 = vst.msk [vmem:[%s3151_s6] sm:$0xff] %vm1050_vm3, %v1238_v3  ;;  %v1246_v4 = vpack.c.bf16 %v1238_v3, %v1238_v3  ;;  %s3542_s6 = sld [smem:[#allocation46_spill]] (!%p2389_p5) }
 0x439   : > { %2324 = vmatmul.msk.bf16.vlgmr.msrb.gmra.mxu1 %vm1050_vm3, %v1246_v4 }
 0x45f   : > { %v1489_v61 = vpop.permute.xlu1 %1488 }
 0x460   : > { %v3271_v63 = vpack.c.bf16 %v1489_v61, %v1489_v61 }
 0x462   : > { %v1556_v1 = vsel %vm1050_vm3, %v3271_v63, 0 }
 0x463   : > { %1565 = vmatpush.bf16.xpose.msrb.mxu2 %v1556_v1 }
 0x467   : > { %v1331_v5 = vpop.f32.mrf.mxu0  ;;  %v1486_v3 = vpop.permute.xlu1 %1485 }
 0x468   : > { %v3279_v4 = vpack.c.bf16 %v1486_v3, %v1486_v3 }
 0x469   : > { %v1310_v7 = vpop.f32.mrf.mxu3 }
 0x46a   : > { %1340 = vrot.lane.b32.xlu0 %v1310_v7, %s2870_s9  ;;  %v2548_v7 = vld [vmem:[%s3536_s23] ss:$0 sm:$0xff] }
 0x46f   : > { %v1333_v8 = vpop.f32.mrf.mxu0 }
 0x471   : > { %v1312_v9 = vpop.f32.mrf.mxu3 }
 0x480   : > { %v1289_v10 = vpop.f32.mrf.mxu2 }
 0x481   : > { %1336 = vrot.lane.b32.xlu2 %v1289_v10, %s2871_s24 }
 0x488   : > { %v1291_v12 = vpop.f32.mrf.mxu2 }
 0x489   : > { %1344 = vrot.lane.b32.xlu2 %v1331_v5, %s2872_s27  ;;  %v1537_v5 = vsel %vm1050_vm3, %v3279_v4, 0 }
 0x48a   : > { %1546 = vmatpush.bf16.xpose.msrb.mxu1 %v1537_v5 }
 0x4b6   : > { %v1268_v6 = vpop.f32.mrf.mxu1 }
 0x4be   : > { %v1270_v13 = vpop.f32.mrf.mxu1 }
 0x4db   : > { %v1337_v16 = vpop.permute.xlu2 %1336 }
 0x4dc   : > { %v1347_v17 = vsel %vm1050_vm3, %v1268_v6, %v1337_v16  ;;  %v1341_v18 = vpop.permute.xlu0 %1340 }
 0x4dd   : > { %v1349_v19 = vsel %vm1348_vm8, %v1347_v17, %v1341_v18 }
 0x4e3   : > { %v1345_v20 = vpop.permute.xlu2 %1344 }
 0x4e4   : > { %v1351_v21 = vsel %vm1350_vm9, %v1349_v19, %v1345_v20 }
 0x4e5   : > { %v1352_v22 = vpack.c.bf16 %v1351_v21, %v1351_v21 }
 0x4e7   : > { %2336 = vmatmul.msk.bf16.vlgmr.msra.gmra.mxu1 %vm1014_vm2, %v1352_v22 }
 0x564   : > { %v1385_v24 = vpop.f32.mrf.mxu1 }
 0x565   : > { %v1386_v25 = vadd.f32 %v2545_v23, %v1385_v24 }
 0x567   : > { %v1389_v26 = vadd.f32 %v1386_v25, %v3169_v11 }
 0x569   : > { %v1392_v27 = vsel %vm1014_vm2, %v1389_v26, 0.0 }
 0x56a   : > { %1393 = vadd.xlane.f32.xlu0 %v1392_v27 }
 0x56c   : > { %v1387_v28 = vpop.f32.mrf.mxu1 }
 0x5dd   : > { %v1394_v36 = vpop.xlane.xlu0 %1393 }
 0x5de   : > { %v1402_v37 = vmul.f32 %v3248_v35, %v1394_v36 }
 0x5e0   : > { %v1403_v38 = vsub.f32 %v1389_v26, %v1402_v37 }
 0x5e2   : > { %v1404_v39 = vmul.f32 %v1403_v38, %v1403_v38 }
 0x5e4   : > { %v1405_v11 = vsel %vm1014_vm2, %v1404_v39, 0.0 }
 0x5e5   : > { %1406 = vadd.xlane.f32.xlu2 %v1405_v11 }
 0x5fd   : > { %1482 = vrot.lane.b32.xlu2 %v1466_v42, %s2866_s7 }
 0x658   : > { %v1407_v43 = vpop.xlane.xlu2 %1406 }
 0x659   : > { %v1408_v45 = vmul.f32 %v1407_v43, %v3248_v35 }
 0x65b   : > { %v1409_v47 = vadd.f32 1e-05, %v1408_v45 }
 0x65d   : > { %2574 = vrsqrt.f32 %v1409_v47  ;;  %vm1416_vm12 = vweird.f32 %v1409_v47 }
 0x660   : > { %v1483_v62 = vpop.permute.xlu2 %1482 }
 0x661   : > { %v3273_v0 = vpack.c.bf16 %v1483_v62, %v1483_v62 }
 0x663   : > { %v2575_v48 = vpop.eup %2574  ;;  %v1518_v2 = vsel %vm1050_vm3, %v3273_v0, 0  ;;  %v1704_v46 = vunpack.c.l.b16 %v3273_v0 }
 0x664   : > { %v1411_v49 = vmul.f32 %v2575_v48, %v1409_v47  ;;  %vm1417_vm11 = vweird.f32 %v2575_v48  ;;  %1527 = vmatpush.bf16.xpose.msrb.mxu0 %v1518_v2 }
 0x665   : > { %vm1418_vm13 = vmor %vm1416_vm12, %vm1417_vm11  ;;  %v1705_v47 = vpack.c.b16 %v1704_v46, %v1704_v46 }
 0x666   : > { %v1412_v50 = vmul.f32 %v2575_v48, %v1411_v49  ;;  %v1728_v49 = vunpack.c.l.b16 %v3279_v4 }
 0x668   : > { %v1413_v51 = vmul.f32 0.5, %v1412_v50 }
 0x66a   : > { %v1414_v52 = vsub.f32 1.5, %v1413_v51  ;;  %v1680_v51 = vunpack.c.l.b16 %v3253_v44 }
 0x66c   : > { %v1415_v53 = vmul.f32 %v2575_v48, %v1414_v52  ;;  %v1729_v52 = vpack.c.b16 %v1728_v49, %v1728_v49 }
 0x66e   : > { %v1419_v55 = vsel %vm1418_vm13, %v2575_v48, %v1415_v53  ;;  %v1752_v48 = vunpack.c.l.b16 %v3271_v63  ;;  %v1681_v53 = vpack.c.b16 %v1680_v51, %v1680_v51 }
 0x66f   : > { %v1420_v57 = vmul.f32 %v1419_v55, %v1403_v38 }
 0x670   : > { %v1753_v50 = vpack.c.b16 %v1752_v48, %v1752_v48 }
 0x671   : > { %v1424_v58 = vmul.f32 %v2546_v54, %v1420_v57 }
 0x673   : > { %v3266_v59 = vadd.f32 %v2547_v56, %v1424_v58 }
 0x675   : > { %v1429_v60 = vpack.c.bf16 %v3266_v59, %v3266_v59 }
 0x677   : > { %2345 = vmatmul.msk.bf16.vlgmr.msra.gmra.mxu2 %vm1014_vm2, %v1429_v60 }
 0x6fa   : > { %v1462_v8 = vpop.f32.mrf.mxu2 }
 0x6fb   : > { %v1463_v9 = vadd.f32 %v2548_v7, %v1462_v8 }
 0x6fd   : > { %v1477_v10 = vpack.c.bf16 %v1463_v9, %v1463_v9  ;;  %1468 = vrot.lane.b32.xlu1 %v1463_v9, %s2866_s7  ;;  %1474 = vrot.lane.b32.xlu0 %v1463_v9, %s2865_s29  ;;  %s3539_s29 = sld [smem:[#allocation42_spill]] }
 0x6ff   : > { %2346 = vmatmul.msk.bf16.vlgmr.msra.gmra.mxu3 %vm1050_vm3, %v1477_v10 }
 0x702   : > { %v1464_v12 = vpop.f32.mrf.mxu2 }
 0x705   : > { %1471 = vrot.lane.b32.xlu0 %v1463_v9, %s2867_s2 }
 0x76f   : > { %v1469_v6 = vpop.permute.xlu1 %1468  ;;  %v1475_v13 = vpop.permute.xlu0 %1474 }
 0x770   : > { %v1478_v14 = vpack.c.bf16 %v1469_v6, %v1469_v6  ;;  %v1480_v15 = vpack.c.bf16 %v1475_v13, %v1475_v13 }
 0x772   : > { %2347 = vmatmul.msk.bf16.vlgmr.msrb.gmra.mxu0 %vm1050_vm3, %v1478_v14  ;;  %2349 = vmatmul.msk.bf16.vlgmr.msrb.gmra.mxu2 %vm1050_vm3, %v1480_v15 }
 0x777   : > { %v1472_v16 = vpop.permute.xlu0 %1471 }
 0x778   : > { %v1479_v17 = vpack.c.bf16 %v1472_v16, %v1472_v16 }
 0x77a   : > { %2348 = vmatmul.msk.bf16.vlgmr.msrb.gmra.mxu1 %vm1050_vm3, %v1479_v17 }
 0x782   : > { %v1510_v18 = vpop.f32.mrf.mxu3 }
 0x783   : > { %v1571_v28 = vsel %vm1050_vm3, %v1510_v18, -inf }
 0x78a   : > { %v1512_v19 = vpop.f32.mrf.mxu3 }
 0x7ef   : > { %v1529_v20 = vpop.f32.mrf.mxu0 }
 0x7f0   : > { %v1574_v21 = vsel %vm1050_vm3, %v1529_v20, -inf }
 0x7f1   : > { %1575 = vmax.xlane.f32.xlu2 %v1574_v21 }
 0x7f5   : > { %v1567_v22 = vpop.f32.mrf.mxu2 }
 0x7f6   : > { %v1580_v23 = vsel %vm1050_vm3, %v1567_v22, -inf }
 0x7f7   : > { %1581 = vmax.xlane.f32.xlu1 %v1580_v23  ;;  %v1531_v24 = vpop.f32.mrf.mxu0  ;;  %v1548_v25 = vpop.f32.mrf.mxu1 }
 0x7f8   : > { %v1577_v26 = vsel %vm1050_vm3, %v1548_v25, -inf }
 0x7f9   : > { %1578 = vmax.xlane.f32.xlu0 %v1577_v26 }
 0x7fd   : > { %v1569_v27 = vpop.f32.mrf.mxu2 }
 0x7ff   : > { %v1550_v29 = vpop.f32.mrf.mxu1  ;;  %1572 = vmax.xlane.f32.xlu1 %v1571_v28 }
 0x864   : > { %v1576_v30 = vpop.xlane.xlu2 %1575 }
 0x865   : > { %v1584_v31 = vsub.f32 %v1529_v20, %v1576_v30 }
 0x867   : > { %v1589_v32 = vmul.f32 1.442695, %v1584_v31 }
 0x869   : > { %2576 = vpow2.f32 %v1589_v32 }
 0x86a   : > { %v1582_v33 = vpop.xlane.xlu1 %1581 }
 0x86b   : > { %v1586_v34 = vsub.f32 %v1567_v22, %v1582_v33 }
 0x86c   : > { %v1579_v36 = vpop.xlane.xlu0 %1578 }
 0x86d   : > { %v1593_v37 = vmul.f32 1.442695, %v1586_v34  ;;  %v1585_v38 = vsub.f32 %v1548_v25, %v1579_v36 }
 0x86f   : > { %v2577_v39 = vpop.eup %2576  ;;  %2578 = vpow2.f32 %v1593_v37  ;;  %v1591_v11 = vmul.f32 1.442695, %v1585_v38 }
 0x870   : > { %v1598_v40 = vsel %vm1050_vm3, %v2577_v39, 0.0 }
 0x871   : > { %2580 = vpow2.f32 %v1591_v11  ;;  %1599 = vadd.xlane.f32.xlu0 %v1598_v40 }
 0x872   : > { %v1573_v54 = vpop.xlane.xlu1 %1572 }
 0x873   : > { %v1583_v55 = vsub.f32 %v1510_v18, %v1573_v54 }
 0x875   : > { %v3298_v41 = vpop.eup %2578  ;;  %v1587_v56 = vmul.f32 1.442695, %v1583_v55 }
 0x876   : > { %v1604_v42 = vsel %vm1050_vm3, %v3298_v41, 0.0 }
 0x877   : > { %v3302_v43 = vpop.eup %2580  ;;  %1605 = vadd.xlane.f32.xlu2 %v1604_v42  ;;  %2582 = vpow2.f32 %v1587_v56 }
 0x878   : > { %v1601_v45 = vsel %vm1050_vm3, %v3302_v43, 0.0 }
 0x879   : > { %1602 = vadd.xlane.f32.xlu1 %v1601_v45 }
 0x87d   : > { %v3314_v57 = vpop.eup %2582 }
 0x87e   : > { %v1595_v58 = vsel %vm1050_vm3, %v3314_v57, 0.0 }
 0x885   : > { %1706 = vrot.lane.b32.xlu0 %v1705_v47, %s2868_s20 }
 0x88f   : > { %1754 = vrot.lane.b32.xlu2 %v1753_v50, %s2868_s20 }
 0x892   : > { %1730 = vrot.lane.b32.xlu1 %v1729_v52, %s2868_s20 }
 0x897   : > { %1682 = vrot.lane.b32.xlu2 %v1681_v53, %s2868_s20  ;;  %s3540_s20 = sld [smem:[#allocation44_spill]] }
 0x8af   : > { %1596 = vadd.xlane.f32.xlu0 %v1595_v58 }
 0x8e4   : > { %v1600_v60 = vpop.xlane.xlu0 %1599 }
 0x8e5   : > { %2584 = vrcp.f32 %v1600_v60  ;;  %v1633_v1 = vand.u32 2147483648, %v1600_v60  ;;  %v1631_v3 = vand.u32 2147483647, %v1600_v60  ;;  %vm1627_vm15 = vweird.f32 %v1600_v60 }
 0x8e7   : > { %v1634_v10 = vor.u32 1.1754944e-38, %v1633_v1  ;;  %vm1632_vm1 = vcmp.eq.f32.partialorder %v1631_v3, 8.507059e+37 }
 0x8ea   : > { %v1606_v61 = vpop.xlane.xlu2 %1605 }
 0x8eb   : > { %v2585_v44 = vpop.eup %2584  ;;  %2586 = vrcp.f32 %v1606_v61  ;;  %v1661_v16 = vand.u32 2147483647, %v1606_v61  ;;  %v1663_v17 = vand.u32 2147483648, %v1606_v61  ;;  %vm1657_vm6 = vweird.f32 %v1606_v61 }
 0x8ec   : > { %v1623_v62 = vmul.f32 %v2585_v44, %v1600_v60  ;;  %v1603_v63 = vpop.xlane.xlu1 %1602  ;;  %vm1628_vm14 = vweird.f32 %v2585_v44 }
 0x8ed   : > { %2588 = vrcp.f32 %v1603_v63  ;;  %vm1629_vm0 = vmor %vm1627_vm15, %vm1628_vm14  ;;  %v1646_v21 = vand.u32 2147483647, %v1603_v63  ;;  %v1648_v22 = vand.u32 2147483648, %v1603_v63  ;;  %vm1662_vm11 = vcmp.eq.f32.partialorder %v1661_v16, 8.507059e+37 }
 0x8ee   : > { %v1624_v0 = vsub.f32 1.0, %v1623_v62  ;;  %v1664_v27 = vor.u32 1.1754944e-38, %v1663_v17  ;;  %vm1642_vm12 = vweird.f32 %v1603_v63 }
 0x8ef   : > { %v1649_v32 = vor.u32 1.1754944e-38, %v1648_v22  ;;  %vm1647_vm14 = vcmp.eq.f32.partialorder %v1646_v21, 8.507059e+37  ;;  %v2405_v22 = vld [vmem:[#allocation12 + $0x8] sm:$0xff] }
 0x8f0   : > { %v1625_v2 = vmul.f32 %v2585_v44, %v1624_v0 }
 0x8f1   : > { %v2587_v4 = vpop.eup %2586 }
 0x8f2   : > { %v1626_v5 = vadd.f32 %v2585_v44, %v1625_v2  ;;  %v1653_v7 = vmul.f32 %v2587_v4, %v1606_v61  ;;  %v1755_v8 = vpop.permute.xlu2 %1754  ;;  %vm1658_vm5 = vweird.f32 %v2587_v4  ;;  %v2402_v2 = vld [vmem:[#allocation10] sm:$0xff] }
 0x8f3   : > { %v2589_v9 = vpop.eup %2588  ;;  %v1760_v12 = vsel %vm1255_vm4, %v1755_v8, 0  ;;  %vm1659_vm10 = vmor %vm1657_vm6, %vm1658_vm5 }
 0x8f4   : > { %v1630_v6 = vsel %vm1629_vm0, %v2585_v44, %v1626_v5  ;;  %v1654_v13 = vsub.f32 1.0, %v1653_v7  ;;  %v1638_v14 = vmul.f32 %v2589_v9, %v1603_v63  ;;  %1769 = vmatpush.bf16.msra.mxu2 %v1760_v12  ;;  %vm1643_vm7 = vweird.f32 %v2589_v9  ;;  %v2549_v12 = vld [vmem:[%s3459_s11] ss:$0 sm:$0xff] }
 0x8f5   : > { %v1635_v15 = vsel %vm1632_vm1, %v1634_v10, %v1630_v6  ;;  %vm1644_vm13 = vmor %vm1642_vm12, %vm1643_vm7 }
 0x8f6   : > { %v1668_v18 = vmul.f32 %v2577_v39, %v1635_v15  ;;  %v1655_v19 = vmul.f32 %v2587_v4, %v1654_v13  ;;  %v1639_v20 = vsub.f32 1.0, %v1638_v14 }
 0x8f7   : > { %v1707_v23 = vpop.permute.xlu0 %1706 }
 0x8f8   : > { %1672 = vst.msk [vmem:[%s3156_s19 + $0x8] sm:$0xff] %vm1050_vm3, %v1668_v18  ;;  %v1656_v24 = vadd.f32 %v2587_v4, %v1655_v19  ;;  %v1640_v25 = vmul.f32 %v2589_v9, %v1639_v20  ;;  %v1712_v26 = vsel %vm1255_vm4, %v1707_v23, 0  ;;  %v1676_v30 = vpack.c.bf16 %v1668_v18, %v1668_v18  ;;  %v2404_v23 = vld [vmem:[#allocation12] sm:$0xff] }
 0x8f9   : > { %1721 = vmatpush.bf16.msra.mxu0 %v1712_v26  ;;  %v2408_v26 = vld [vmem:[%s3462_s14 + $0x10] sm:$0xff] }
 0x8fa   : > { %v1660_v28 = vsel %vm1659_vm10, %v2587_v4, %v1656_v24  ;;  %v1641_v29 = vadd.f32 %v2589_v9, %v1640_v25 }
 0x8fb   : > { %v1665_v31 = vsel %vm1662_vm11, %v1664_v27, %v1660_v28 }
 0x8fc   : > { %v1670_v33 = vmul.f32 %v3298_v41, %v1665_v31  ;;  %v1645_v34 = vsel %vm1644_vm13, %v2589_v9, %v1641_v29  ;;  %2351 = vmatmul.msk.bf16.vlgmr.msra.gmra.mxu0 %vm1050_vm3, %v1676_v30  ;;  %v1683_v41 = vpop.permute.xlu2 %1682 }
 0x8fd   : > { %v1650_v36 = vsel %vm1647_vm14, %v1649_v32, %v1645_v34  ;;  %v1688_v42 = vsel %vm1255_vm4, %v1683_v41, 0  ;;  %1890 = vmatpush.bf16.msrb.mxu0 %v2405_v22  ;;  %v2550_v34 = vld [vmem:[%s3466_s18] ss:$0 sm:$0xff]  ;;  %v2407_v41 = vld [vmem:[%s3462_s14 + $0x8] sm:$0xff] }
 0x8fe   : > { %1674 = vst.msk [vmem:[%s3156_s19 + $0x18] sm:$0xff] %vm1050_vm3, %v1670_v33  ;;  %v1669_v37 = vmul.f32 %v3302_v43, %v1650_v36  ;;  %v1678_v38 = vpack.c.bf16 %v1670_v33, %v1670_v33  ;;  %1697 = vmatpush.bf16.msrb.mxu3 %v1688_v42  ;;  %v2406_v42 = vld [vmem:[%s3462_s14] sm:$0xff] }
 0x900   : > { %1673 = vst.msk [vmem:[%s3156_s19 + $0x10] sm:$0xff] %vm1050_vm3, %v1669_v37  ;;  %2353 = vmatmul.msk.bf16.vlgmr.msra.gmra.mxu2 %vm1050_vm3, %v1678_v38  ;;  %v1677_v40 = vpack.c.bf16 %v1669_v37, %v1669_v37  ;;  %v2551_v37 = vld [vmem:[%s3537_s4] ss:$0 sm:$0xff] }
 0x901   : > { %1891 = vmatpush.bf16.msrb.mxu0 %v2404_v23 }
 0x904   : > { %v1731_v39 = vpop.permute.xlu1 %1730 }
 0x905   : > { %v1736_v11 = vsel %vm1255_vm4, %v1731_v39, 0 }
 0x906   : > { %1745 = vmatpush.bf16.msra.mxu1 %v1736_v11 }
 0x909   : > { %2352 = vmatmul.msk.bf16.vlgmr.msra.gmra.mxu1 %vm1050_vm3, %v1677_v40 }
 0x922   : > { %v1597_v45 = vpop.xlane.xlu0 %1596 }
 0x923   : > { %2590 = vrcp.f32 %v1597_v45  ;;  %v1618_v48 = vand.u32 2147483648, %v1597_v45  ;;  %v1616_v50 = vand.u32 2147483647, %v1597_v45  ;;  %vm1612_vm0 = vweird.f32 %v1597_v45 }
 0x925   : > { %v1619_v52 = vor.u32 1.1754944e-38, %v1618_v48  ;;  %vm1617_vm5 = vcmp.eq.f32.partialorder %v1616_v50, 8.507059e+37  ;;  %v2553_v50 = vld [vmem:[%s3539_s29] ss:$0 sm:$0xff] }
 0x929   : > { %v2591_v43 = vpop.eup %2590 }
 0x92a   : > { %v1608_v46 = vmul.f32 %v2591_v43, %v1597_v45  ;;  %vm1613_vm15 = vweird.f32 %v2591_v43  ;;  %v2552_v45 = vld [vmem:[%s3538_s22] ss:$0 sm:$0xff] }
 0x92b   : > { %vm1614_vm1 = vmor %vm1612_vm0, %vm1613_vm15 }
 0x92c   : > { %v1609_v47 = vsub.f32 1.0, %v1608_v46 }
 0x92e   : > { %v1610_v49 = vmul.f32 %v2591_v43, %v1609_v47 }
 0x930   : > { %v1611_v51 = vadd.f32 %v2591_v43, %v1610_v49 }
 0x932   : > { %v1615_v53 = vsel %vm1614_vm1, %v2591_v43, %v1611_v51 }
 0x933   : > { %v1620_v54 = vsel %vm1617_vm5, %v1619_v52, %v1615_v53 }
 0x934   : > { %v1667_v55 = vmul.f32 %v3314_v57, %v1620_v54  ;;  %v2403_v57 = vld [vmem:[#allocation10 + $0x8] sm:$0xff] }
 0x935   : > { %1820 = vmatpush.bf16.msra.mxu3 %v2403_v57 }
 0x936   : > { %1671 = vst.msk [vmem:[%s3156_s19] sm:$0xff] %vm1050_vm3, %v1667_v55  ;;  %v1675_v56 = vpack.c.bf16 %v1667_v55, %v1667_v55 }
 0x938   : > { %2350 = vmatmul.msk.bf16.vlgmr.msrb.gmra.mxu3 %vm1050_vm3, %v1675_v56 }
 0x939   : > { %1821 = vmatpush.bf16.msra.mxu3 %v2402_v2 }
 0x979   : > { %v1723_v58 = vpop.f32.mrf.mxu0 }
 0x97a   : > { %1776 = vrot.lane.b32.xlu1 %v1723_v58, %s2871_s24  ;;  %s3541_s24 = sld [smem:[#allocation45_spill]] }
 0x981   : > { %v1725_v60 = vpop.f32.mrf.mxu0 }
 0x983   : > { %v1771_v61 = vpop.f32.mrf.mxu2 }
 0x984   : > { %1784 = vrot.lane.b32.xlu1 %v1771_v61, %s2872_s27 }
 0x986   : > { %v1747_v44 = vpop.f32.mrf.mxu1 }
 0x987   : > { %1780 = vrot.lane.b32.xlu2 %v1747_v44, %s2870_s9 }
 0x98b   : > { %v1773_v62 = vpop.f32.mrf.mxu2 }
 0x98e   : > { %v1749_v63 = vpop.f32.mrf.mxu1 }
 0x9bb   : > { %v1699_v0 = vpop.f32.mrf.mxu3 }
 0x9c3   : > { %v1701_v1 = vpop.f32.mrf.mxu3 }
 0x9e1   : > { %v1781_v5 = vpop.permute.xlu2 %1780 }
 0x9ec   : > { %v1777_v3 = vpop.permute.xlu1 %1776 }
 0x9ed   : > { %v1787_v4 = vsel %vm1050_vm3, %v1699_v0, %v1777_v3 }
 0x9ee   : > { %v1788_v7 = vsel %vm1348_vm8, %v1787_v4, %v1781_v5 }
 0x9f6   : > { %v1785_v8 = vpop.permute.xlu1 %1784 }
 0x9f7   : > { %v1789_v9 = vsel %vm1350_vm9, %v1788_v7, %v1785_v8  ;;  %vm1935_vm9 = vcmask 523264   ;;  %v2554_v7 = vld [vmem:[%s3540_s20] ss:$0 sm:$0xff] }
 0x9f8   : > { %v1790_v10 = vpack.c.bf16 %v1789_v9, %v1789_v9  ;;  %v2555_v9 = vld [vmem:[%s3541_s24] ss:$0 sm:$0xff] }
 0x9fa   : > { %2362 = vmatmul.msk.bf16.vlgmr.msra.gmra.mxu3 %vm1014_vm2, %v1790_v10 }
 0xa7d   : > { %v1823_v6 = vpop.f32.mrf.mxu3 }
 0xa7e   : > { %v1824_v13 = vadd.f32 %v2549_v12, %v1823_v6 }
 0xa80   : > { %v1827_v14 = vadd.f32 %v1824_v13, %v3266_v59  ;;  %v2409_v59 = vld [vmem:[%s3462_s14 + $0x18] sm:$0xff] }
 0xa81   : > { %1943 = vmatpush.bf16.msrb.mxu1 %v2409_v59 }
 0xa82   : > { %v1830_v15 = vsel %vm1014_vm2, %v1827_v14, 0.0 }
 0xa83   : > { %1831 = vadd.xlane.f32.xlu2 %v1830_v15 }
 0xa85   : > { %v1825_v16 = vpop.f32.mrf.mxu3  ;;  %1944 = vmatpush.bf16.msrb.mxu1 %v2408_v26 }
 0xa89   : > { %1945 = vmatpush.bf16.msrb.mxu1 %v2407_v41 }
 0xa8d   : > { %1946 = vmatpush.bf16.msrb.mxu1 %v2406_v42 }
 0xaf6   : > { %v1832_v17 = vpop.xlane.xlu2 %1831 }
 0xaf7   : > { %v1833_v18 = vmul.f32 %v1832_v17, %v3248_v35 }
 0xaf9   : > { %v1834_v19 = vsub.f32 %v1827_v14, %v1833_v18 }
 0xafb   : > { %v1835_v20 = vmul.f32 %v1834_v19, %v1834_v19 }
 0xafd   : > { %v1836_v21 = vsel %vm1014_vm2, %v1835_v20, 0.0 }
 0xafe   : > { %1837 = vadd.xlane.f32.xlu1 %v1836_v21 }
 0xb71   : > { %v1838_v24 = vpop.xlane.xlu1 %1837 }
 0xb72   : > { %v1839_v25 = vmul.f32 %v1838_v24, %v3248_v35 }
 0xb74   : > { %v1840_v27 = vadd.f32 1e-05, %v1839_v25 }
 0xb76   : > { %2592 = vrsqrt.f32 %v1840_v27  ;;  %vm1847_vm4 = vweird.f32 %v1840_v27 }
 0xb7c   : > { %v2593_v28 = vpop.eup %2592 }
 0xb7d   : > { %v1842_v29 = vmul.f32 %v2593_v28, %v1840_v27  ;;  %vm1848_vm3 = vweird.f32 %v2593_v28 }
 0xb7e   : > { %vm1849_vm8 = vmor %vm1847_vm4, %vm1848_vm3 }
 0xb7f   : > { %v1843_v30 = vmul.f32 %v2593_v28, %v1842_v29 }
 0xb81   : > { %v1844_v31 = vmul.f32 0.5, %v1843_v30 }
 0xb83   : > { %v1845_v32 = vsub.f32 1.5, %v1844_v31 }
 0xb85   : > { %v1846_v33 = vmul.f32 %v2593_v28, %v1845_v32 }
 0xb87   : > { %v1850_v36 = vsel %vm1849_vm8, %v2593_v28, %v1846_v33 }
 0xb88   : > { %v1851_v38 = vmul.f32 %v1850_v36, %v1834_v19 }
 0xb8a   : > { %v1855_v39 = vmul.f32 %v2550_v34, %v1851_v38 }
 0xb8c   : > { %v1859_v11 = vadd.f32 %v2551_v37, %v1855_v39 }
 0xb8e   : > { %v1860_v40 = vpack.c.bf16 %v1859_v11, %v1859_v11 }
 0xb90   : > { %2371 = vmatmul.msk.bf16.vlgmr.msrb.gmra.mxu0 %vm1014_vm2, %v1860_v40 }
 0xc0d   : > { %v1893_v43 = vpop.f32.mrf.mxu0 }
 0xc0e   : > { %v1894_v46 = vadd.f32 %v2552_v45, %v1893_v43 }
 0xc10   : > { %v1897_v47 = vmax.f32 %v1894_v46, 0.0 }
 0xc12   : > { %v1898_v48 = vpack.c.bf16 %v1897_v47, %v1897_v47 }
 0xc14   : > { %2388 = vmatmul.msk.bf16.vlgmr.msrb.gmra.mxu1 %vm1935_vm9, %v1898_v48 }
 0xc15   : > { %v1895_v49 = vpop.f32.mrf.mxu0 }
 0xc91   : > { %v1948_v51 = vpop.f32.mrf.mxu1 }
 0xc92   : > { %v1949_v52 = vadd.f32 %v2553_v50, %v1948_v51 }
 0xc94   : > { %v1952_v53 = vadd.f32 %v1949_v52, %v1859_v11 }
 0xc96   : > { %v1955_v54 = vsel %vm1014_vm2, %v1952_v53, 0.0 }
 0xc97   : > { %1956 = vadd.xlane.f32.xlu0 %v1955_v54 }
 0xc99   : > { %v1950_v55 = vpop.f32.mrf.mxu1 }
 0xd0a   : > { %v1957_v56 = vpop.xlane.xlu0 %1956 }
 0xd0b   : > { %v1958_v58 = vmul.f32 %v1957_v56, %v3248_v35 }
 0xd0d   : > { %v1959_v60 = vsub.f32 %v1952_v53, %v1958_v58 }
 0xd0f   : > { %v1960_v61 = vmul.f32 %v1959_v60, %v1959_v60 }
 0xd11   : > { %v1961_v44 = vsel %vm1014_vm2, %v1960_v61, 0.0 }
 0xd12   : > { %1962 = vadd.xlane.f32.xlu0 %v1961_v44 }
 0xd85   : > { %v1963_v62 = vpop.xlane.xlu0 %1962 }
 0xd86   : > { %v1964_v63 = vmul.f32 %v1963_v62, %v3248_v35 }
 0xd88   : > { %v1965_v0 = vadd.f32 1e-05, %v1964_v63 }
 0xd8a   : > { %2594 = vrsqrt.f32 %v1965_v0  ;;  %vm1972_vm7 = vweird.f32 %v1965_v0 }
 0xd90   : > { %v2595_v1 = vpop.eup %2594 }
 0xd91   : > { %v1967_v57 = vmul.f32 %v2595_v1, %v1965_v0  ;;  %vm1973_vm6 = vweird.f32 %v2595_v1 }
 0xd92   : > { %vm1974_vm10 = vmor %vm1972_vm7, %vm1973_vm6 }
 0xd93   : > { %v1968_v2 = vmul.f32 %v2595_v1, %v1967_v57 }
 0xd95   : > { %v1969_v3 = vmul.f32 0.5, %v1968_v2 }
 0xd97   : > { %v1970_v4 = vsub.f32 1.5, %v1969_v3 }
 0xd99   : > { %v1971_v5 = vmul.f32 %v2595_v1, %v1970_v4 }
 0xd9b   : > { %v1975_v8 = vsel %vm1974_vm10, %v2595_v1, %v1971_v5 }
 0xd9c   : > { %v1976_v10 = vmul.f32 %v1975_v8, %v1959_v60 }
 0xd9e   : > { %v1980_v12 = vmul.f32 %v2554_v7, %v1976_v10  ;;  %1989 = sbr.rel (%p2389_p5) target bundleno = 3760 (0xeb0), region = 144 }
 0xda0   : > { %v1984_v6 = vadd.f32 %v2555_v9, %v1980_v12 }
 0xda2   : > { %1985 = vst.msk [vmem:[#allocation2] sm:$0xff] %vm1014_vm2, %v1984_v6 }
 0xda3   : > { %v1992_v13 = vsel %vm1014_vm2, %v1984_v6, 0.0  ;;  %v2596_v27 = vld [vmem:[%s3542_s6] ss:$0 sm:$0xff] }
 0xda4   : > { %1993 = vadd.xlane.f32.xlu0 %v1992_v13 }
 0xe17   : > { %v1994_v14 = vpop.xlane.xlu0 %1993 }
 0xe18   : > { %v1995_v15 = vmul.f32 %v1994_v14, %v3248_v35 }
 0xe1a   : > { %v1996_v16 = vsub.f32 %v1984_v6, %v1995_v15 }
 0xe1c   : > { %v1997_v17 = vmul.f32 %v1996_v16, %v1996_v16 }
 0xe1e   : > { %v1998_v18 = vsel %vm1014_vm2, %v1997_v17, 0.0 }
 0xe1f   : > { %1999 = vadd.xlane.f32.xlu0 %v1998_v18 }
 0xe92   : > { %v2000_v19 = vpop.xlane.xlu0 %1999 }
 0xe93   : > { %v2001_v20 = vmul.f32 %v2000_v19, %v3248_v35  ;;  %v2597_v35 = vld [vmem:[%s3543_s12] ss:$0 sm:$0xff] }
 0xe95   : > { %v2002_v21 = vadd.f32 1e-05, %v2001_v20 }
 0xe97   : > { %2598 = vrsqrt.f32 %v2002_v21  ;;  %vm2009_vm12 = vweird.f32 %v2002_v21 }
 0xe9d   : > { %v2599_v22 = vpop.eup %2598 }
 0xe9e   : > { %v2004_v23 = vmul.f32 %v2599_v22, %v2002_v21  ;;  %vm2010_vm11 = vweird.f32 %v2599_v22 }
 0xe9f   : > { %vm2011_vm13 = vmor %vm2009_vm12, %vm2010_vm11 }
 0xea0   : > { %v2005_v59 = vmul.f32 %v2599_v22, %v2004_v23 }
 0xea2   : > { %v2006_v24 = vmul.f32 0.5, %v2005_v59 }
 0xea4   : > { %v2007_v25 = vsub.f32 1.5, %v2006_v24 }
 0xea6   : > { %v2008_v26 = vmul.f32 %v2599_v22, %v2007_v25 }
 0xea8   : > { %v2012_v28 = vsel %vm2011_vm13, %v2599_v22, %v2008_v26 }
 0xea9   : > { %v2013_v29 = vmul.f32 %v2012_v28, %v1996_v16 }
 0xeab   : > { %v2017_v30 = vmul.f32 %v2596_v27, %v2013_v29 }
 0xead   : > { %v2021_v31 = vadd.f32 %v2597_v35, %v2017_v30 }
 0xeaf   : > { %2022 = vst.msk [vmem:[%s895_s3] sm:$0xff] %vm1014_vm2, %v2021_v31 }
 0xeb0 PF: > { %s3544_s13 = sld [smem:[#allocation19_spill]]  ;;  %s2391_s5 = sshll.u32 %s2844_s8, 3 }
 0xeb1   : > { %s3546_s23 = sld [smem:[#allocation48_spill]]  ;;  %s2054_s29 = sshll.u32 %s895_s3, 4  ;;  %s2055_s29 = int_to_ptr.vmem [resolvable:$true] %s2054_s29 }
 0xeb6   : > { %s3547_s2 = sand.u32 1, %s3544_s13  }
 0xeb7   : > { %s2052_s19 = scalar_lea.hbm %s3546_s23, %s2391_s5  ;;  %s2024_s20 = scalar_lea.sflag [#allocation6], %s3547_s2 }
 0xeb8   : > { %s2056_s7 = sshll.u32 %s2052_s19, 4  ;;  %s2770_s28 = scalar_lea.hbm %s3546_s23, 16  ;;  %s2057_s7 = int_to_ptr.hbm [resolvable:$true] %s2056_s7 }
 0xeb9   : > { %s2764_s21 = sshra.s32 %s2057_s7, 4  ;;  %s2765_s21 = int_to_ptr.hbm [resolvable:$true] %s2764_s21 }
 0xeba   : > { %s2766_s9 = scalar_lea.hbm %s2765_s21, 8  ;;  %p2771_p10 = scmp.lt.s32.totalorder %s2765_s21, %s3546_s23 }
 0xebb   : > { %p2767_p6 = scmp.ne.s32.totalorder %s2765_s21, %s2766_s9  ;;  %p2772_p11 = scmp.lt.s32.totalorder %s2770_s28, %s2766_s9 }
 0xebd   : > { %p2768_p7 = pnand %p2767_p6, %p3059_p3  ;;  %p2773_p12 = por %p2772_p11, %p2771_p10 }
 0xebf   : > { %p2769_p8 = pneg %p2768_p7 }
 0xec1   : > { %p2774_p13 = pnand %p2773_p12, %p2769_p8 }
 0xec3   : > { %2777 = shalt.err (!%p2774_p13)
}
 0xec4   : > { %2430 = dma.vmem_to_hbm [thread:$0]  (%p3059_p3), %s2055_s29, 128, %s2057_s7, %s2024_s20  }
 0xec5 PF: > { %s3548_s3 = sld [smem:[#allocation23_spill]] }
 0xec6   : > { %s3549_s15 = sld [smem:[#allocation18_spill]] }
 0xecb   : > { %p2462_p0 = scmp.ge.s32.totalorder %s3548_s3, 2 }
 0xecc   : > { %s2074_s0 = sand.u32 1, %s3549_s15  }
 0xecd   : > { %p2449_p1 = pnand %p2462_p0, %p3069_p9  ;;  %s2075_s12 = scalar_lea.sflag [#allocation6], %s2074_s0 }
 0xecf   : > { %p2450_p2 = pneg %p2449_p1 }
 0xed1   : > { %2823 = dma.done.wait (%p2450_p2), %s2075_s12, 128  }
 0xed2   : > { %2825 = vsyncadd (%p2450_p2), %s2075_s12, 4294967168  ;;  %s43_s0 = sadd.s32 1, %s3548_s3   ;;  %s3551_s27 = sld [smem:[#allocation19_spill]] }
 0xed3   : > { %p40_p4 = scmp.ge.s32.totalorder %s43_s0, 6   ;;  %s3552_s3 = sld [smem:[#allocation20_spill]] }
 0xed4   : > { %s3553_s7 = sld [smem:[#allocation28_spill]] }
 0xed5   : > { %s3554_s28 = sld [smem:[#allocation21_spill]]  ;;  %42 = sbr.rel (!%p40_p4) target bundleno = 29 (0x1d), region = 207 }
 0xed6   : > { %s3555_s8 = sld [smem:[#allocation22_spill]] }
 0xed7   : > { %s3556_s4 = sld [smem:[#allocation24_spill]] }
 0xed8   : > { %s3557_s29 = sld [smem:[#allocation26_spill]] }
 0xeda   :  { %2105 = vsyncpa [#allocation5], 1 }
 0xedb   :  { %2107 = vsyncpa [#allocation5 + $0x1], 1 }
 0xedc   :  { %2108 = vsyncpa [#allocation8], 1 }
 0xedd   :  { %2109 = vsyncpa [#allocation11], 1 }
 0xede   :  { %2110 = vsyncpa [#allocation6], 1 }
 0xedf   :  { %2112 = vsyncpa [#allocation6 + $0x1], 1 }

</bundles_post_ra>
